<compile_context>
chip_gen: v5e
topology: v5e:2x2
jax: 0.10.0
libtpu: 0.0.40
codegen_flags: <defaults>
</compile_context>

<pallas_src>
import jax
import jax.numpy as jnp
from jax.experimental import pallas as pl
from jax.experimental.pallas import tpu as pltpu

# ---------------- problem dimensions (small, self-consistent) ----------------
D = 8            # input_dim
H = 32           # hidden_dim
R = D            # num_resources  (required: == input_dim)
O = 3 * D - 4    # num_objectives (required: == 3*input_dim - 4)  -> 20
B = 8            # batch

# (in_features, out_features) for every nn.Linear, fixed global order.
LAYER_DIMS = [
    (2, H), (H, H), (H, 2),              # 0-2   hyperparam.param_predictor
    (2, H), (H, 1),                      # 3-4   hyperparam.value_estimator
    (2 * D, H), (H, H), (H, R),          # 5-7   resource_manager.allocation_network
    (2 * D, H), (H, 1),                  # 8-9   resource_manager.efficiency_predictor
    (D, H), (H, H),                      # 10-11 performance_optimizer.analyzer
    (H, H), (H, D),                      # 12-13 performance_optimizer.bottleneck_detector
    (H + D, H), (H, D),                  # 14-15 performance_optimizer.strategy_network
    (D, H), (H, 1),                      # 16-17 adaptive.lr_adapter
    (D, H), (H, 1),                      # 18-19 adaptive.momentum_adapter
    (D, H), (H, 3),                      # 20-21 adaptive.strategy_selector
    (O, H), (H, O),                      # 22-23 multi_objective.weight_network
    (O, H), (H, H), (H, O),              # 24-26 multi_objective.pareto_network
    (6 * D, 2 * H), (2 * H, H), (H, D),  # 27-29 integration
    (7 * D, H), (H, 7),                  # 30-31 state_assessment
]
NUM_LAYERS = len(LAYER_DIMS)

# ---- packed output slab layout (single lane-dense (B,128) f32 output) ----
_OUT_NAMES_WIDTHS = [
    ("integrated", D), ("state_metrics", 7), ("resource_allocation", R),
    ("efficiency", 1), ("optimization_strategy", D), ("performance_analysis", H),
    ("bottlenecks", D), ("lr", 1), ("momentum", 1), ("strategy3", 3),
    ("objective_weights", O), ("pareto_points", O),
]
OUT_LAYOUT = {}
_off = 0
for _n, _w in _OUT_NAMES_WIDTHS:
    OUT_LAYOUT[_n] = (_off, _w)
    _off += _w
OUT_USED = _off          # 117
OUT_WIDTH = 128          # lane-dense slab


# --------------------------------- kernel ------------------------------------
def _enhanced_opt_kernel(x_ref, rl_ref, obj_ref,
                         w1_ref, b1_ref, w2a_ref, b2a_ref, w2b_ref, b2b_ref,
                         wd44_ref, wlm_ref, bde_ref, ws_ref, bs_ref,
                         w14_ref, w28_ref, w30i_ref,
                         out_ref):
    f32, bf16 = jnp.float32, jnp.bfloat16

    def mm(a, w_bf16):
        # MXU matmul: bf16 inputs, f32 accumulation.
        return jnp.dot(a.astype(bf16), w_bf16, preferred_element_type=f32)

    relu = lambda z: jnp.maximum(z, 0.0)

    def sigmoid(z):                       # exact (correctness-concern fix)
        return 1.0 / (1.0 + jnp.exp(-z))

    def softmax(z):                       # exact division
        e = jnp.exp(z - jnp.max(z, axis=-1, keepdims=True))
        return e / jnp.sum(e, axis=-1, keepdims=True)

    x = x_ref[...]                        # (TB, D)  f32
    rl = rl_ref[...]                      # (TB, D)
    obj = obj_ref[...]                    # (TB, O)

    # ---- stage 1: ONE block-diag matmul over cat[x, rl, obj] -> (TB, 256) ----
    # cols: 0:32 analysis1 | 32:64 lr_h | 64:96 mom_h | 96:128 s3_h
    #       128:160 alloc_h | 160:192 eff_h | 192:224 ow_h | 224:256 par_h
    xro = jnp.concatenate([x, rl, obj], axis=-1)                 # (TB, 36)
    h1 = relu(mm(xro, w1_ref[...]) + b1_ref[...])                # (TB, 256)

    # ---- stage 2a: ONE block-diag matmul for 8 second-stage heads -> (TB, 128) ----
    # cols: 0:32 analysis | 32:64 a2 | 64:96 p2 | 96 lr | 97 mom | 98:101 s3 |
    #       101 eff | 102:122 objw | 122:128 pad
    h2 = mm(h1, w2a_ref[...]) + b2a_ref[...]
    apb = relu(h2[:, 0:96])               # [analysis | a2 | p2], all ReLU
    analysis = apb[:, 0:H]
    lr = sigmoid(h2[:, 96:97])
    momentum = sigmoid(h2[:, 97:98])
    strat3 = softmax(h2[:, 98:101])
    eff = sigmoid(h2[:, 101:102])
    objw = softmax(h2[:, 102:102 + O])

    # ---- stage 2b: ONE block-diag matmul (BOT1 | ALLOC_OUT | PAR_OUT) -> (TB, 64) ----
    h3 = mm(apb, w2b_ref[...]) + b2b_ref[...]
    bd1 = relu(h3[:, 0:H])
    alloc = softmax(h3[:, H:H + R])
    pareto = h3[:, H + R:H + R + O]

    # ---- performance-optimizer tail (serial critical chain) ----
    bottlenecks = sigmoid((mm(bd1, ws_ref[0]) + bs_ref[0])[:, 0:D])          # layer 13
    st = relu(mm(jnp.concatenate([analysis, bottlenecks], axis=-1),          # layer 14,
                 w14_ref[...]) + bs_ref[4])                                  # one K=40 matmul
    strategy = (mm(st, ws_ref[1]) + bs_ref[1])[:, 0:D]                       # layer 15

    # ---- integration / state-assessment fused first layers ----
    # acc = cat[x, alloc, strategy, objw] @ WD44 + lr*row_lr + mom*row_mom + (bias + op-fold)
    acc_in = jnp.concatenate([x, alloc, strategy, objw], axis=-1)            # (TB, 44)
    wlm = wlm_ref[...]                                                       # (2, 96) f32
    acc = (mm(acc_in, wd44_ref[...])
           + lr * wlm[0:1, :] + momentum * wlm[1:2, :]
           + bde_ref[...])                                                   # (TB, 96)

    g2 = relu(mm(relu(acc[:, 0:2 * H]), w28_ref[...]) + bs_ref[5])           # layer 28
    integrated = (mm(g2, ws_ref[2]) + bs_ref[2])[:, 0:D]                     # layer 29
    sm = relu(acc[:, 2 * H:3 * H] + mm(integrated, w30i_ref[...]))           # layer 30 tail
    state_metrics = (mm(sm, ws_ref[3]) + bs_ref[3])[:, 0:7]                  # layer 31

    # ---- single unmasked lane-dense store of the full (TB, 128) slab ----
    pad = jnp.zeros((x.shape[0], OUT_WIDTH - OUT_USED), f32)
    out_ref[...] = jnp.concatenate(
        [integrated, state_metrics, alloc, eff, strategy, analysis,
         bottlenecks, lr, momentum, strat3, objw, pareto, pad], axis=-1)


# ------------------------------ params & packing ------------------------------
def init_params(key):
    """Per-layer init (uniform(-1/sqrt(fan_in), 1/sqrt(fan_in)), like torch)."""
    keys = jax.random.split(key, NUM_LAYERS)
    params = []
    for k, (fi, fo) in zip(keys, LAYER_DIMS):
        kw, kb = jax.random.split(k)
        bound = 1.0 / (fi ** 0.5)
        W = jax.random.uniform(kw, (fi, fo), jnp.float32, -bound, bound)
        b = jax.random.uniform(kb, (1, fo), jnp.float32, -bound, bound)
        params += [W, b]
    return params


def pack_params(params):
    """Pack the 64 per-layer arrays into 14 fused/stacked kernel operands."""
    bf16 = jnp.bfloat16

    def wb(i):
        return params[2 * i], params[2 * i + 1]

    hyper = [wb(i) for i in range(5)]    # layers 0-4 stay host-side (constant input)

    # --- stage 1 block-diag weight: cat[x, rl, obj] (36) -> 256 columns ---
    W10, b10 = wb(10); W16, b16 = wb(16); W18, b18 = wb(18); W20, b20 = wb(20)
    W5, b5 = wb(5);    W8, b8 = wb(8);    W22, b22 = wb(22); W24, b24 = wb(24)
    W1 = jnp.zeros((2 * D + O, 256), jnp.float32)
    W1 = W1.at[0:D, 0:32].set(W10).at[0:D, 32:64].set(W16)
    W1 = W1.at[0:D, 64:96].set(W18).at[0:D, 96:128].set(W20)
    W1 = W1.at[0:D, 128:160].set(W5[0:D]).at[0:D, 160:192].set(W8[0:D])
    W1 = W1.at[D:2 * D, 128:160].set(W5[D:2 * D]).at[D:2 * D, 160:192].set(W8[D:2 * D])
    W1 = W1.at[2 * D:2 * D + O, 192:224].set(W22).at[2 * D:2 * D + O, 224:256].set(W24)
    B1 = jnp.concatenate([b10, b16, b18, b20, b5, b8, b22, b24], axis=1)     # (1, 256)

    # --- stage 2a block-diag weight: h1 (256) -> 128 columns ---
    W11, b11 = wb(11); W6, b6 = wb(6); W25, b25 = wb(25)
    W17, b17 = wb(17); W19, b19 = wb(19); W21, b21 = wb(21)
    W9, b9 = wb(9);    W23, b23 = wb(23)
    W2A = jnp.zeros((256, 128), jnp.float32)
    W2A = W2A.at[0:32, 0:32].set(W11)            # analysis1 -> analysis
    W2A = W2A.at[128:160, 32:64].set(W6)         # alloc_h   -> a2
    W2A = W2A.at[224:256, 64:96].set(W25)        # par_h     -> p2
    W2A = W2A.at[32:64, 96:97].set(W17)          # lr_h      -> lr
    W2A = W2A.at[64:96, 97:98].set(W19)          # mom_h     -> momentum
    W2A = W2A.at[96:128, 98:101].set(W21)        # s3_h      -> strategy3
    W2A = W2A.at[160:192, 101:102].set(W9)       # eff_h     -> efficiency
    W2A = W2A.at[192:224, 102:102 + O].set(W23)  # ow_h      -> objective_weights
    B2A = jnp.zeros((1, 128), jnp.float32)
    B2A = B2A.at[:, 0:32].set(b11).at[:, 32:64].set(b6).at[:, 64:96].set(b25)
    B2A = B2A.at[:, 96:97].set(b17).at[:, 97:98].set(b19).at[:, 98:101].set(b21)
    B2A = B2A.at[:, 101:102].set(b9).at[:, 102:102 + O].set(b23)

    # --- stage 2b block-diag weight: [analysis|a2|p2] (96) -> 64 columns ---
    W12, b12 = wb(12); W7, b7 = wb(7); W26, b26 = wb(26)
    W2B = jnp.zeros((96, 64), jnp.float32)
    W2B = W2B.at[0:32, 0:32].set(W12)                       # analysis -> bd1
    W2B = W2B.at[32:64, 32:32 + R].set(W7)                  # a2 -> allocation
    W2B = W2B.at[64:96, 32 + R:32 + R + O].set(W26)         # p2 -> pareto
    B2B = jnp.zeros((1, 64), jnp.float32)
    B2B = B2B.at[:, 0:32].set(b12).at[:, 32:32 + R].set(b7).at[:, 32 + R:32 + R + O].set(b26)

    # --- fused integration/state first layers (pre-split, pre-cast) ---
    W27, b27 = wb(27); W30, b30 = wb(30)
    WDfull = jnp.concatenate([W27, W30[0:6 * D]], axis=1)             # (48, 96) f32
    WD44 = jnp.concatenate([WDfull[0:D],                              # x rows
                            WDfull[D + 2:3 * D + 2],                  # alloc | strategy rows
                            WDfull[3 * D + 4:6 * D]], axis=0)         # objw rows -> (44, 96)
    WLM = WDfull[3 * D + 2:3 * D + 4]                                 # (2, 96) lr / momentum rows
    WOP = WDfull[D:D + 2]                                             # (2, 96) optimal_params rows
    bD = jnp.concatenate([b27, b30], axis=1)                          # (1, 96)

    # --- remaining small layers (stacked slabs) ---
    W13, b13 = wb(13); W14, b14 = wb(14); W15, b15 = wb(15)
    W28, b28 = wb(28); W29, b29 = wb(29); W31, b31 = wb(31)
    W30i = W30[6 * D:7 * D]                                           # (8, 32)

    def padn(a):
        return jnp.pad(a, ((0, 0), (0, H - a.shape[1])))

    WS = jnp.stack([padn(W13), padn(W15), padn(W29), padn(W31)]).astype(bf16)   # (4, 32, 32)
    BS = jnp.stack([padn(b13), padn(b15), padn(b29), padn(b31), b14, b28])      # (6, 1, 32) f32

    return dict(hyper=hyper,
                W1=W1.astype(bf16), B1=B1,
                W2A=W2A.astype(bf16), B2A=B2A,
                W2B=W2B.astype(bf16), B2B=B2B,
                WD44=WD44.astype(bf16), WLM=WLM, WOP=WOP, bD=bD,
                WS=WS, BS=BS,
                W14=W14.astype(bf16), W28=W28.astype(bf16), W30i=W30i.astype(bf16))


# --------------------------------- wrapper ------------------------------------
def _hyper_forward(hyper, current_params):
    """Layers 0-4 (constant input) computed once with plain jnp, outside the kernel."""
    (W0, b0), (W1, b1), (W2, b2), (W3, b3), (W4, b4) = hyper
    h = jax.nn.relu(current_params @ W0 + b0)
    h = jax.nn.relu(h @ W1 + b1)
    optimal_params = h @ W2 + b2                  # (1, 2)
    v = jax.nn.relu(optimal_params @ W3 + b3)
    param_value = v @ W4 + b4                     # (1, 1)
    return optimal_params, param_value


def _round_up(n, m):
    return ((n + m - 1) // m) * m


def enhanced_optimization_forward(x, packed, resource_limits=None, objectives=None):
    batch = x.shape[0]
    if resource_limits is None:
        resource_limits = jnp.ones_like(x)
    if objectives is None:
        objectives = jnp.ones((batch, O), x.dtype)

    current_params = jnp.array([[1e-3, 0.9]], dtype=jnp.float32)      # [lr, momentum]
    optimal_params, param_value = _hyper_forward(packed["hyper"], current_params)
    # fold constant optimal_params rows into the fused integration/state bias
    bDe = packed["bD"] + optimal_params @ packed["WOP"]               # (1, 96)

    # batch tiling: big M tiles for real batches (MXU-M utilization, v7x megacore),
    # single tile for tiny batches.
    if batch >= 256:
        TB = 256
    elif batch >= 128:
        TB = 128
    else:
        TB = _round_up(max(batch, 1), 8)
    b_pad = _round_up(batch, TB)

    def pad_rows(a):
        return a if a.shape[0] == b_pad else jnp.pad(a, ((0, b_pad - a.shape[0]), (0, 0)))

    xp, rlp, objp = pad_rows(x), pad_rows(resource_limits), pad_rows(objectives)

    weights = [packed["W1"], packed["B1"], packed["W2A"], packed["B2A"],
               packed["W2B"], packed["B2B"], packed["WD44"], packed["WLM"], bDe,
               packed["WS"], packed["BS"], packed["W14"], packed["W28"], packed["W30i"]]

    def row_spec(width):
        return pl.BlockSpec((TB, width), lambda i: (i, 0))

    def const_spec(arr):                      # weights stay resident across grid steps
        nd = arr.ndim
        return pl.BlockSpec(arr.shape, lambda i, _nd=nd: (0,) * _nd)

    slab = pl.pallas_call(
        _enhanced_opt_kernel,
        out_shape=jax.ShapeDtypeStruct((b_pad, OUT_WIDTH), jnp.float32),
        grid=(b_pad // TB,),
        in_specs=[row_spec(D), row_spec(D), row_spec(O)] + [const_spec(w) for w in weights],
        out_specs=row_spec(OUT_WIDTH),
        compiler_params=pltpu.CompilerParams(dimension_semantics=("parallel",)),
    )(xp, rlp, objp, *weights)

    outs = {name: slab[:batch, s:s + w] for name, (s, w) in OUT_LAYOUT.items()}
    outs["optimal_params"] = optimal_params
    outs["param_value"] = param_value
    return outs


def build_optimization_state(outs, total_steps, successful_optimizations):
    """Python-side bookkeeping (mirrors the torch module's scalar stats)."""
    total_steps += 1
    successful_optimizations += float(outs["param_value"].mean() > 0.5)
    state = {
        "performance_score": float(outs["param_value"].mean()),
        "resource_efficiency": float(outs["efficiency"].mean()),
        "convergence_rate": successful_optimizations / total_steps,
        "stability_score": float(jnp.std(outs["strategy3"], ddof=1)),  # torch .std() unbiased
        "adaptation_rate": float(outs["lr"].mean()),
        "optimization_progress": float(outs["performance_analysis"].mean()),
        "resource_utilization": float(outs["resource_allocation"].mean()),
    }
    return outs["integrated"], state, total_steps, successful_optimizations


# TODO(synk): DistributedComputation (ray-based parallel_execute) is runtime
# orchestration, not part of the forward math — not representable in Pallas.

if __name__ == "__main__":
    key = jax.random.PRNGKey(0)
    pkey, xkey = jax.random.split(key)
    params = init_params(pkey)
    packed = pack_params(params)
    x = jax.random.normal(xkey, (B, D), jnp.float32)
    objectives = jnp.ones((B, O), jnp.float32)

    outs = enhanced_optimization_forward(x, packed, objectives=objectives)
    outs = jax.tree_util.tree_map(jax.block_until_ready, outs)

    integrated, opt_state, _, _ = build_optimization_state(outs, 0, 0.0)
    assert integrated.shape == (B, D)
    assert outs["state_metrics"].shape == (B, 7)
    assert outs["resource_allocation"].shape == (B, R)
    assert outs["objective_weights"].shape == (B, O)
    assert outs["pareto_points"].shape == (B, O)
    assert all(bool(jnp.isfinite(jnp.asarray(v)).all()) for v in outs.values())
    print("KERNEL_OK")
</pallas_src>

<mosaic_0001>
module attributes {stable_mosaic.version = 11 : i64} {
  func.func @_enhanced_opt_kernel(%arg0: i32, %arg1: memref<8x8xf32, #tpu.memory_space<vmem>>, %arg2: memref<8x8xf32, #tpu.memory_space<vmem>>, %arg3: memref<8x20xf32, #tpu.memory_space<vmem>>, %arg4: memref<36x256xbf16, #tpu.memory_space<vmem>>, %arg5: memref<1x256xf32, #tpu.memory_space<vmem>>, %arg6: memref<256x128xbf16, #tpu.memory_space<vmem>>, %arg7: memref<1x128xf32, #tpu.memory_space<vmem>>, %arg8: memref<96x64xbf16, #tpu.memory_space<vmem>>, %arg9: memref<1x64xf32, #tpu.memory_space<vmem>>, %arg10: memref<44x96xbf16, #tpu.memory_space<vmem>>, %arg11: memref<2x96xf32, #tpu.memory_space<vmem>>, %arg12: memref<1x96xf32, #tpu.memory_space<vmem>>, %arg13: memref<4x32x32xbf16, #tpu.memory_space<vmem>>, %arg14: memref<6x1x32xf32, #tpu.memory_space<vmem>>, %arg15: memref<40x32xbf16, #tpu.memory_space<vmem>>, %arg16: memref<64x32xbf16, #tpu.memory_space<vmem>>, %arg17: memref<8x32xbf16, #tpu.memory_space<vmem>>, %arg18: memref<8x128xf32, #tpu.memory_space<vmem>>) attributes {dimension_semantics = [#tpu.dimension_semantics<parallel>], iteration_bounds = array<i64: 1>, scalar_prefetch = 0 : i64, scratch_operands = 0 : i64, tpu.core_type = #tpu.core_type<tc>, window_params = [{transform_indices = @transform_0, window_bounds = array<i64: 8, 8>}, {transform_indices = @transform_1, window_bounds = array<i64: 8, 8>}, {transform_indices = @transform_2, window_bounds = array<i64: 8, 20>}, {pipeline_mode = #tpu.pipeline_mode<synchronous>, transform_indices = @transform_3, window_bounds = array<i64: 36, 256>}, {pipeline_mode = #tpu.pipeline_mode<synchronous>, transform_indices = @transform_4, window_bounds = array<i64: 1, 256>}, {pipeline_mode = #tpu.pipeline_mode<synchronous>, transform_indices = @transform_5, window_bounds = array<i64: 256, 128>}, {pipeline_mode = #tpu.pipeline_mode<synchronous>, transform_indices = @transform_6, window_bounds = array<i64: 1, 128>}, {pipeline_mode = #tpu.pipeline_mode<synchronous>, transform_indices = @transform_7, window_bounds = array<i64: 96, 64>}, {pipeline_mode = #tpu.pipeline_mode<synchronous>, transform_indices = @transform_8, window_bounds = array<i64: 1, 64>}, {pipeline_mode = #tpu.pipeline_mode<synchronous>, transform_indices = @transform_9, window_bounds = array<i64: 44, 96>}, {pipeline_mode = #tpu.pipeline_mode<synchronous>, transform_indices = @transform_10, window_bounds = array<i64: 2, 96>}, {pipeline_mode = #tpu.pipeline_mode<synchronous>, transform_indices = @transform_11, window_bounds = array<i64: 1, 96>}, {pipeline_mode = #tpu.pipeline_mode<synchronous>, transform_indices = @transform_12, window_bounds = array<i64: 4, 32, 32>}, {pipeline_mode = #tpu.pipeline_mode<synchronous>, transform_indices = @transform_13, window_bounds = array<i64: 6, 1, 32>}, {pipeline_mode = #tpu.pipeline_mode<synchronous>, transform_indices = @transform_14, window_bounds = array<i64: 40, 32>}, {pipeline_mode = #tpu.pipeline_mode<synchronous>, transform_indices = @transform_15, window_bounds = array<i64: 64, 32>}, {pipeline_mode = #tpu.pipeline_mode<synchronous>, transform_indices = @transform_16, window_bounds = array<i64: 8, 32>}, {transform_indices = @transform_17, window_bounds = array<i64: 8, 128>}]} {
    %c0 = arith.constant 0 : index
    %c0_0 = arith.constant 0 : index
    %0 = vector.load %arg1[%c0, %c0_0] : memref<8x8xf32, #tpu.memory_space<vmem>>, vector<8x8xf32>
    %c0_1 = arith.constant 0 : index
    %c0_2 = arith.constant 0 : index
    %1 = vector.load %arg2[%c0_1, %c0_2] : memref<8x8xf32, #tpu.memory_space<vmem>>, vector<8x8xf32>
    %c0_3 = arith.constant 0 : index
    %c0_4 = arith.constant 0 : index
    %2 = vector.load %arg3[%c0_3, %c0_4] : memref<8x20xf32, #tpu.memory_space<vmem>>, vector<8x20xf32>
    %3 = tpu.concatenate %0, %1, %2 in 1 : vector<8x8xf32>, vector<8x8xf32>, vector<8x20xf32> -> vector<8x36xf32>
    %c0_5 = arith.constant 0 : index
    %c0_6 = arith.constant 0 : index
    %4 = vector.load %arg4[%c0_5, %c0_6] : memref<36x256xbf16, #tpu.memory_space<vmem>>, vector<36x256xbf16>
    %5 = arith.truncf %3 : vector<8x36xf32> to vector<8x36xbf16>
    %cst = arith.constant dense<0.000000e+00> : vector<8x256xf32>
    %6 = tpu.matmul %5, %4, %cst {dimension_numbers = #tpu.dot_dimension_numbers<[1], [0], [0], [1], [0, 0, 1, 1], [], []>} : vector<8x36xbf16>, vector<36x256xbf16>, vector<8x256xf32> -> vector<8x256xf32>
    %c0_7 = arith.constant 0 : index
    %c0_8 = arith.constant 0 : index
    %7 = vector.load %arg5[%c0_7, %c0_8] : memref<1x256xf32, #tpu.memory_space<vmem>>, vector<1x256xf32>
    %8 = vector.broadcast %7 : vector<1x256xf32> to vector<8x256xf32>
    %9 = arith.addf %6, %8 : vector<8x256xf32>
    %cst_9 = arith.constant 0.000000e+00 : f32
    %10 = vector.broadcast %cst_9 : f32 to vector<8x256xf32>
    %11 = arith.maximumf %9, %10 : vector<8x256xf32>
    %c0_10 = arith.constant 0 : index
    %c0_11 = arith.constant 0 : index
    %12 = vector.load %arg6[%c0_10, %c0_11] : memref<256x128xbf16, #tpu.memory_space<vmem>>, vector<256x128xbf16>
    %13 = arith.truncf %11 : vector<8x256xf32> to vector<8x256xbf16>
    %cst_12 = arith.constant dense<0.000000e+00> : vector<8x128xf32>
    %14 = tpu.matmul %13, %12, %cst_12 {dimension_numbers = #tpu.dot_dimension_numbers<[1], [0], [0], [1], [0, 0, 1, 1], [], []>} : vector<8x256xbf16>, vector<256x128xbf16>, vector<8x128xf32> -> vector<8x128xf32>
    %c0_13 = arith.constant 0 : index
    %c0_14 = arith.constant 0 : index
    %15 = vector.load %arg7[%c0_13, %c0_14] : memref<1x128xf32, #tpu.memory_space<vmem>>, vector<1x128xf32>
    %16 = vector.broadcast %15 : vector<1x128xf32> to vector<8x128xf32>
    %17 = arith.addf %14, %16 : vector<8x128xf32>
    %18 = vector.extract_strided_slice %17 {offsets = [0, 0], sizes = [8, 96], strides = [1, 1]} : vector<8x128xf32> to vector<8x96xf32>
    %cst_15 = arith.constant 0.000000e+00 : f32
    %19 = vector.broadcast %cst_15 : f32 to vector<8x96xf32>
    %20 = arith.maximumf %18, %19 : vector<8x96xf32>
    %21 = vector.extract_strided_slice %20 {offsets = [0, 0], sizes = [8, 32], strides = [1, 1]} : vector<8x96xf32> to vector<8x32xf32>
    %22 = vector.extract_strided_slice %17 {offsets = [0, 96], sizes = [8, 1], strides = [1, 1]} : vector<8x128xf32> to vector<8x1xf32>
    %cst_16 = arith.constant 0.000000e+00 : f32
    %23 = vector.broadcast %cst_16 : f32 to vector<8x1xf32>
    %24 = arith.subf %23, %22 : vector<8x1xf32>
    %25 = math.exp %24 : vector<8x1xf32>
    %cst_17 = arith.constant 1.000000e+00 : f32
    %26 = vector.broadcast %cst_17 : f32 to vector<8x1xf32>
    %27 = arith.addf %26, %25 : vector<8x1xf32>
    %cst_18 = arith.constant 1.000000e+00 : f32
    %28 = vector.broadcast %cst_18 : f32 to vector<8x1xf32>
    %29 = arith.divf %28, %27 : vector<8x1xf32>
    %30 = vector.extract_strided_slice %17 {offsets = [0, 97], sizes = [8, 1], strides = [1, 1]} : vector<8x128xf32> to vector<8x1xf32>
    %cst_19 = arith.constant 0.000000e+00 : f32
    %31 = vector.broadcast %cst_19 : f32 to vector<8x1xf32>
    %32 = arith.subf %31, %30 : vector<8x1xf32>
    %33 = math.exp %32 : vector<8x1xf32>
    %cst_20 = arith.constant 1.000000e+00 : f32
    %34 = vector.broadcast %cst_20 : f32 to vector<8x1xf32>
    %35 = arith.addf %34, %33 : vector<8x1xf32>
    %cst_21 = arith.constant 1.000000e+00 : f32
    %36 = vector.broadcast %cst_21 : f32 to vector<8x1xf32>
    %37 = arith.divf %36, %35 : vector<8x1xf32>
    %38 = vector.extract_strided_slice %17 {offsets = [0, 98], sizes = [8, 3], strides = [1, 1]} : vector<8x128xf32> to vector<8x3xf32>
    %cst_22 = arith.constant dense<0xFF800000> : vector<8xf32>
    %39 = vector.multi_reduction <maximumf>, %38, %cst_22 [1] : vector<8x3xf32> to vector<8xf32>
    %40 = vector.shape_cast %39 : vector<8xf32> to vector<8x1xf32>
    %41 = vector.broadcast %40 : vector<8x1xf32> to vector<8x3xf32>
    %42 = arith.subf %38, %41 : vector<8x3xf32>
    %43 = math.exp %42 : vector<8x3xf32>
    %cst_23 = arith.constant dense<0.000000e+00> : vector<8xf32>
    %44 = vector.multi_reduction <add>, %43, %cst_23 [1] : vector<8x3xf32> to vector<8xf32>
    %45 = vector.shape_cast %44 : vector<8xf32> to vector<8x1xf32>
    %46 = vector.broadcast %45 : vector<8x1xf32> to vector<8x3xf32>
    %47 = arith.divf %43, %46 : vector<8x3xf32>
    %48 = vector.extract_strided_slice %17 {offsets = [0, 101], sizes = [8, 1], strides = [1, 1]} : vector<8x128xf32> to vector<8x1xf32>
    %cst_24 = arith.constant 0.000000e+00 : f32
    %49 = vector.broadcast %cst_24 : f32 to vector<8x1xf32>
    %50 = arith.subf %49, %48 : vector<8x1xf32>
    %51 = math.exp %50 : vector<8x1xf32>
    %cst_25 = arith.constant 1.000000e+00 : f32
    %52 = vector.broadcast %cst_25 : f32 to vector<8x1xf32>
    %53 = arith.addf %52, %51 : vector<8x1xf32>
    %cst_26 = arith.constant 1.000000e+00 : f32
    %54 = vector.broadcast %cst_26 : f32 to vector<8x1xf32>
    %55 = arith.divf %54, %53 : vector<8x1xf32>
    %56 = vector.extract_strided_slice %17 {offsets = [0, 102], sizes = [8, 20], strides = [1, 1]} : vector<8x128xf32> to vector<8x20xf32>
    %cst_27 = arith.constant dense<0xFF800000> : vector<8xf32>
    %57 = vector.multi_reduction <maximumf>, %56, %cst_27 [1] : vector<8x20xf32> to vector<8xf32>
    %58 = vector.shape_cast %57 : vector<8xf32> to vector<8x1xf32>
    %59 = vector.broadcast %58 : vector<8x1xf32> to vector<8x20xf32>
    %60 = arith.subf %56, %59 : vector<8x20xf32>
    %61 = math.exp %60 : vector<8x20xf32>
    %cst_28 = arith.constant dense<0.000000e+00> : vector<8xf32>
    %62 = vector.multi_reduction <add>, %61, %cst_28 [1] : vector<8x20xf32> to vector<8xf32>
    %63 = vector.shape_cast %62 : vector<8xf32> to vector<8x1xf32>
    %64 = vector.broadcast %63 : vector<8x1xf32> to vector<8x20xf32>
    %65 = arith.divf %61, %64 : vector<8x20xf32>
    %c0_29 = arith.constant 0 : index
    %c0_30 = arith.constant 0 : index
    %66 = vector.load %arg8[%c0_29, %c0_30] : memref<96x64xbf16, #tpu.memory_space<vmem>>, vector<96x64xbf16>
    %67 = arith.truncf %20 : vector<8x96xf32> to vector<8x96xbf16>
    %cst_31 = arith.constant dense<0.000000e+00> : vector<8x64xf32>
    %68 = tpu.matmul %67, %66, %cst_31 {dimension_numbers = #tpu.dot_dimension_numbers<[1], [0], [0], [1], [0, 0, 1, 1], [], []>} : vector<8x96xbf16>, vector<96x64xbf16>, vector<8x64xf32> -> vector<8x64xf32>
    %c0_32 = arith.constant 0 : index
    %c0_33 = arith.constant 0 : index
    %69 = vector.load %arg9[%c0_32, %c0_33] : memref<1x64xf32, #tpu.memory_space<vmem>>, vector<1x64xf32>
    %70 = vector.broadcast %69 : vector<1x64xf32> to vector<8x64xf32>
    %71 = arith.addf %68, %70 : vector<8x64xf32>
    %72 = vector.extract_strided_slice %71 {offsets = [0, 0], sizes = [8, 32], strides = [1, 1]} : vector<8x64xf32> to vector<8x32xf32>
    %cst_34 = arith.constant 0.000000e+00 : f32
    %73 = vector.broadcast %cst_34 : f32 to vector<8x32xf32>
    %74 = arith.maximumf %72, %73 : vector<8x32xf32>
    %75 = vector.extract_strided_slice %71 {offsets = [0, 32], sizes = [8, 8], strides = [1, 1]} : vector<8x64xf32> to vector<8x8xf32>
    %cst_35 = arith.constant dense<0xFF800000> : vector<8xf32>
    %76 = vector.multi_reduction <maximumf>, %75, %cst_35 [1] : vector<8x8xf32> to vector<8xf32>
    %77 = vector.shape_cast %76 : vector<8xf32> to vector<8x1xf32>
    %78 = vector.broadcast %77 : vector<8x1xf32> to vector<8x8xf32>
    %79 = arith.subf %75, %78 : vector<8x8xf32>
    %80 = math.exp %79 : vector<8x8xf32>
    %cst_36 = arith.constant dense<0.000000e+00> : vector<8xf32>
    %81 = vector.multi_reduction <add>, %80, %cst_36 [1] : vector<8x8xf32> to vector<8xf32>
    %82 = vector.shape_cast %81 : vector<8xf32> to vector<8x1xf32>
    %83 = vector.broadcast %82 : vector<8x1xf32> to vector<8x8xf32>
    %84 = arith.divf %80, %83 : vector<8x8xf32>
    %85 = vector.extract_strided_slice %71 {offsets = [0, 40], sizes = [8, 20], strides = [1, 1]} : vector<8x64xf32> to vector<8x20xf32>
    %c0_37 = arith.constant 0 : index
    %c0_38 = arith.constant 0 : index
    %c0_39 = arith.constant 0 : index
    %86 = vector.load %arg13[%c0_37, %c0_38, %c0_39] : memref<4x32x32xbf16, #tpu.memory_space<vmem>>, vector<1x32x32xbf16>
    %87 = vector.shape_cast %86 : vector<1x32x32xbf16> to vector<32x32xbf16>
    %88 = arith.truncf %74 : vector<8x32xf32> to vector<8x32xbf16>
    %cst_40 = arith.constant dense<0.000000e+00> : vector<8x32xf32>
    %89 = tpu.matmul %88, %87, %cst_40 {dimension_numbers = #tpu.dot_dimension_numbers<[1], [0], [0], [1], [0, 0, 1, 1], [], []>} : vector<8x32xbf16>, vector<32x32xbf16>, vector<8x32xf32> -> vector<8x32xf32>
    %c0_41 = arith.constant 0 : index
    %c0_42 = arith.constant 0 : index
    %c0_43 = arith.constant 0 : index
    %90 = vector.load %arg14[%c0_41, %c0_42, %c0_43] : memref<6x1x32xf32, #tpu.memory_space<vmem>>, vector<1x1x32xf32>
    %91 = vector.shape_cast %90 : vector<1x1x32xf32> to vector<1x32xf32>
    %92 = vector.broadcast %91 : vector<1x32xf32> to vector<8x32xf32>
    %93 = arith.addf %89, %92 : vector<8x32xf32>
    %94 = vector.extract_strided_slice %93 {offsets = [0, 0], sizes = [8, 8], strides = [1, 1]} : vector<8x32xf32> to vector<8x8xf32>
    %cst_44 = arith.constant 0.000000e+00 : f32
    %95 = vector.broadcast %cst_44 : f32 to vector<8x8xf32>
    %96 = arith.subf %95, %94 : vector<8x8xf32>
    %97 = math.exp %96 : vector<8x8xf32>
    %cst_45 = arith.constant 1.000000e+00 : f32
    %98 = vector.broadcast %cst_45 : f32 to vector<8x8xf32>
    %99 = arith.addf %98, %97 : vector<8x8xf32>
    %cst_46 = arith.constant 1.000000e+00 : f32
    %100 = vector.broadcast %cst_46 : f32 to vector<8x8xf32>
    %101 = arith.divf %100, %99 : vector<8x8xf32>
    %102 = tpu.concatenate %21, %101 in 1 : vector<8x32xf32>, vector<8x8xf32> -> vector<8x40xf32>
    %c0_47 = arith.constant 0 : index
    %c0_48 = arith.constant 0 : index
    %103 = vector.load %arg15[%c0_47, %c0_48] : memref<40x32xbf16, #tpu.memory_space<vmem>>, vector<40x32xbf16>
    %104 = arith.truncf %102 : vector<8x40xf32> to vector<8x40xbf16>
    %cst_49 = arith.constant dense<0.000000e+00> : vector<8x32xf32>
    %105 = tpu.matmul %104, %103, %cst_49 {dimension_numbers = #tpu.dot_dimension_numbers<[1], [0], [0], [1], [0, 0, 1, 1], [], []>} : vector<8x40xbf16>, vector<40x32xbf16>, vector<8x32xf32> -> vector<8x32xf32>
    %c4 = arith.constant 4 : index
    %c0_50 = arith.constant 0 : index
    %c0_51 = arith.constant 0 : index
    %106 = vector.load %arg14[%c4, %c0_50, %c0_51] : memref<6x1x32xf32, #tpu.memory_space<vmem>>, vector<1x1x32xf32>
    %107 = vector.shape_cast %106 : vector<1x1x32xf32> to vector<1x32xf32>
    %108 = vector.broadcast %107 : vector<1x32xf32> to vector<8x32xf32>
    %109 = arith.addf %105, %108 : vector<8x32xf32>
    %cst_52 = arith.constant 0.000000e+00 : f32
    %110 = vector.broadcast %cst_52 : f32 to vector<8x32xf32>
    %111 = arith.maximumf %109, %110 : vector<8x32xf32>
    %c1 = arith.constant 1 : index
    %c0_53 = arith.constant 0 : index
    %c0_54 = arith.constant 0 : index
    %112 = vector.load %arg13[%c1, %c0_53, %c0_54] : memref<4x32x32xbf16, #tpu.memory_space<vmem>>, vector<1x32x32xbf16>
    %113 = vector.shape_cast %112 : vector<1x32x32xbf16> to vector<32x32xbf16>
    %114 = arith.truncf %111 : vector<8x32xf32> to vector<8x32xbf16>
    %cst_55 = arith.constant dense<0.000000e+00> : vector<8x32xf32>
    %115 = tpu.matmul %114, %113, %cst_55 {dimension_numbers = #tpu.dot_dimension_numbers<[1], [0], [0], [1], [0, 0, 1, 1], [], []>} : vector<8x32xbf16>, vector<32x32xbf16>, vector<8x32xf32> -> vector<8x32xf32>
    %c1_56 = arith.constant 1 : index
    %c0_57 = arith.constant 0 : index
    %c0_58 = arith.constant 0 : index
    %116 = vector.load %arg14[%c1_56, %c0_57, %c0_58] : memref<6x1x32xf32, #tpu.memory_space<vmem>>, vector<1x1x32xf32>
    %117 = vector.shape_cast %116 : vector<1x1x32xf32> to vector<1x32xf32>
    %118 = vector.broadcast %117 : vector<1x32xf32> to vector<8x32xf32>
    %119 = arith.addf %115, %118 : vector<8x32xf32>
    %120 = vector.extract_strided_slice %119 {offsets = [0, 0], sizes = [8, 8], strides = [1, 1]} : vector<8x32xf32> to vector<8x8xf32>
    %121 = tpu.concatenate %0, %84, %120, %65 in 1 : vector<8x8xf32>, vector<8x8xf32>, vector<8x8xf32>, vector<8x20xf32> -> vector<8x44xf32>
    %c0_59 = arith.constant 0 : index
    %c0_60 = arith.constant 0 : index
    %122 = vector.load %arg11[%c0_59, %c0_60] : memref<2x96xf32, #tpu.memory_space<vmem>>, vector<2x96xf32>
    %c0_61 = arith.constant 0 : index
    %c0_62 = arith.constant 0 : index
    %123 = vector.load %arg10[%c0_61, %c0_62] : memref<44x96xbf16, #tpu.memory_space<vmem>>, vector<44x96xbf16>
    %124 = arith.truncf %121 : vector<8x44xf32> to vector<8x44xbf16>
    %cst_63 = arith.constant dense<0.000000e+00> : vector<8x96xf32>
    %125 = tpu.matmul %124, %123, %cst_63 {dimension_numbers = #tpu.dot_dimension_numbers<[1], [0], [0], [1], [0, 0, 1, 1], [], []>} : vector<8x44xbf16>, vector<44x96xbf16>, vector<8x96xf32> -> vector<8x96xf32>
    %126 = vector.extract_strided_slice %122 {offsets = [0, 0], sizes = [1, 96], strides = [1, 1]} : vector<2x96xf32> to vector<1x96xf32>
    %127 = vector.broadcast %29 : vector<8x1xf32> to vector<8x96xf32>
    %128 = vector.broadcast %126 : vector<1x96xf32> to vector<8x96xf32>
    %129 = arith.mulf %127, %128 : vector<8x96xf32>
    %130 = arith.addf %125, %129 : vector<8x96xf32>
    %131 = vector.extract_strided_slice %122 {offsets = [1, 0], sizes = [1, 96], strides = [1, 1]} : vector<2x96xf32> to vector<1x96xf32>
    %132 = vector.broadcast %37 : vector<8x1xf32> to vector<8x96xf32>
    %133 = vector.broadcast %131 : vector<1x96xf32> to vector<8x96xf32>
    %134 = arith.mulf %132, %133 : vector<8x96xf32>
    %135 = arith.addf %130, %134 : vector<8x96xf32>
    %c0_64 = arith.constant 0 : index
    %c0_65 = arith.constant 0 : index
    %136 = vector.load %arg12[%c0_64, %c0_65] : memref<1x96xf32, #tpu.memory_space<vmem>>, vector<1x96xf32>
    %137 = vector.broadcast %136 : vector<1x96xf32> to vector<8x96xf32>
    %138 = arith.addf %135, %137 : vector<8x96xf32>
    %139 = vector.extract_strided_slice %138 {offsets = [0, 0], sizes = [8, 64], strides = [1, 1]} : vector<8x96xf32> to vector<8x64xf32>
    %cst_66 = arith.constant 0.000000e+00 : f32
    %140 = vector.broadcast %cst_66 : f32 to vector<8x64xf32>
    %141 = arith.maximumf %139, %140 : vector<8x64xf32>
    %c0_67 = arith.constant 0 : index
    %c0_68 = arith.constant 0 : index
    %142 = vector.load %arg16[%c0_67, %c0_68] : memref<64x32xbf16, #tpu.memory_space<vmem>>, vector<64x32xbf16>
    %143 = arith.truncf %141 : vector<8x64xf32> to vector<8x64xbf16>
    %cst_69 = arith.constant dense<0.000000e+00> : vector<8x32xf32>
    %144 = tpu.matmul %143, %142, %cst_69 {dimension_numbers = #tpu.dot_dimension_numbers<[1], [0], [0], [1], [0, 0, 1, 1], [], []>} : vector<8x64xbf16>, vector<64x32xbf16>, vector<8x32xf32> -> vector<8x32xf32>
    %c5 = arith.constant 5 : index
    %c0_70 = arith.constant 0 : index
    %c0_71 = arith.constant 0 : index
    %145 = vector.load %arg14[%c5, %c0_70, %c0_71] : memref<6x1x32xf32, #tpu.memory_space<vmem>>, vector<1x1x32xf32>
    %146 = vector.shape_cast %145 : vector<1x1x32xf32> to vector<1x32xf32>
    %147 = vector.broadcast %146 : vector<1x32xf32> to vector<8x32xf32>
    %148 = arith.addf %144, %147 : vector<8x32xf32>
    %cst_72 = arith.constant 0.000000e+00 : f32
    %149 = vector.broadcast %cst_72 : f32 to vector<8x32xf32>
    %150 = arith.maximumf %148, %149 : vector<8x32xf32>
    %c2 = arith.constant 2 : index
    %c0_73 = arith.constant 0 : index
    %c0_74 = arith.constant 0 : index
    %151 = vector.load %arg13[%c2, %c0_73, %c0_74] : memref<4x32x32xbf16, #tpu.memory_space<vmem>>, vector<1x32x32xbf16>
    %152 = vector.shape_cast %151 : vector<1x32x32xbf16> to vector<32x32xbf16>
    %153 = arith.truncf %150 : vector<8x32xf32> to vector<8x32xbf16>
    %cst_75 = arith.constant dense<0.000000e+00> : vector<8x32xf32>
    %154 = tpu.matmul %153, %152, %cst_75 {dimension_numbers = #tpu.dot_dimension_numbers<[1], [0], [0], [1], [0, 0, 1, 1], [], []>} : vector<8x32xbf16>, vector<32x32xbf16>, vector<8x32xf32> -> vector<8x32xf32>
    %c2_76 = arith.constant 2 : index
    %c0_77 = arith.constant 0 : index
    %c0_78 = arith.constant 0 : index
    %155 = vector.load %arg14[%c2_76, %c0_77, %c0_78] : memref<6x1x32xf32, #tpu.memory_space<vmem>>, vector<1x1x32xf32>
    %156 = vector.shape_cast %155 : vector<1x1x32xf32> to vector<1x32xf32>
    %157 = vector.broadcast %156 : vector<1x32xf32> to vector<8x32xf32>
    %158 = arith.addf %154, %157 : vector<8x32xf32>
    %159 = vector.extract_strided_slice %158 {offsets = [0, 0], sizes = [8, 8], strides = [1, 1]} : vector<8x32xf32> to vector<8x8xf32>
    %160 = vector.extract_strided_slice %138 {offsets = [0, 64], sizes = [8, 32], strides = [1, 1]} : vector<8x96xf32> to vector<8x32xf32>
    %c0_79 = arith.constant 0 : index
    %c0_80 = arith.constant 0 : index
    %161 = vector.load %arg17[%c0_79, %c0_80] : memref<8x32xbf16, #tpu.memory_space<vmem>>, vector<8x32xbf16>
    %162 = arith.truncf %159 : vector<8x8xf32> to vector<8x8xbf16>
    %cst_81 = arith.constant dense<0.000000e+00> : vector<8x32xf32>
    %163 = tpu.matmul %162, %161, %cst_81 {dimension_numbers = #tpu.dot_dimension_numbers<[1], [0], [0], [1], [0, 0, 1, 1], [], []>} : vector<8x8xbf16>, vector<8x32xbf16>, vector<8x32xf32> -> vector<8x32xf32>
    %164 = arith.addf %160, %163 : vector<8x32xf32>
    %cst_82 = arith.constant 0.000000e+00 : f32
    %165 = vector.broadcast %cst_82 : f32 to vector<8x32xf32>
    %166 = arith.maximumf %164, %165 : vector<8x32xf32>
    %c3 = arith.constant 3 : index
    %c0_83 = arith.constant 0 : index
    %c0_84 = arith.constant 0 : index
    %167 = vector.load %arg13[%c3, %c0_83, %c0_84] : memref<4x32x32xbf16, #tpu.memory_space<vmem>>, vector<1x32x32xbf16>
    %168 = vector.shape_cast %167 : vector<1x32x32xbf16> to vector<32x32xbf16>
    %169 = arith.truncf %166 : vector<8x32xf32> to vector<8x32xbf16>
    %cst_85 = arith.constant dense<0.000000e+00> : vector<8x32xf32>
    %170 = tpu.matmul %169, %168, %cst_85 {dimension_numbers = #tpu.dot_dimension_numbers<[1], [0], [0], [1], [0, 0, 1, 1], [], []>} : vector<8x32xbf16>, vector<32x32xbf16>, vector<8x32xf32> -> vector<8x32xf32>
    %c3_86 = arith.constant 3 : index
    %c0_87 = arith.constant 0 : index
    %c0_88 = arith.constant 0 : index
    %171 = vector.load %arg14[%c3_86, %c0_87, %c0_88] : memref<6x1x32xf32, #tpu.memory_space<vmem>>, vector<1x1x32xf32>
    %172 = vector.shape_cast %171 : vector<1x1x32xf32> to vector<1x32xf32>
    %173 = vector.broadcast %172 : vector<1x32xf32> to vector<8x32xf32>
    %174 = arith.addf %170, %173 : vector<8x32xf32>
    %175 = vector.extract_strided_slice %174 {offsets = [0, 0], sizes = [8, 7], strides = [1, 1]} : vector<8x32xf32> to vector<8x7xf32>
    %cst_89 = arith.constant 0.000000e+00 : f32
    %176 = vector.broadcast %cst_89 : f32 to vector<8x11xf32>
    %177 = tpu.concatenate %159, %175, %84, %55, %120, %21, %101, %29, %37, %47, %65, %85, %176 in 1 : vector<8x8xf32>, vector<8x7xf32>, vector<8x8xf32>, vector<8x1xf32>, vector<8x8xf32>, vector<8x32xf32>, vector<8x8xf32>, vector<8x1xf32>, vector<8x1xf32>, vector<8x3xf32>, vector<8x20xf32>, vector<8x20xf32>, vector<8x11xf32> -> vector<8x128xf32>
    %c0_90 = arith.constant 0 : index
    %c0_91 = arith.constant 0 : index
    %178 = vector.load %arg18[%c0_90, %c0_91] : memref<8x128xf32, #tpu.memory_space<vmem>>, vector<8x128xf32>
    tpu.vector_store %arg18[%c0_90, %c0_91], %177 {strides = array<i32>} : memref<8x128xf32, #tpu.memory_space<vmem>>, vector<8x128xf32>,
    return
  }
  func.func @transform_0(%arg0: i32) -> (i32, i32) {
    %c0_i32 = arith.constant 0 : i32
    %c0_i32_0 = arith.constant 0 : i32
    return %arg0, %c0_i32 : i32, i32
  }
  func.func @transform_1(%arg0: i32) -> (i32, i32) {
    %c0_i32 = arith.constant 0 : i32
    %c0_i32_0 = arith.constant 0 : i32
    return %arg0, %c0_i32 : i32, i32
  }
  func.func @transform_2(%arg0: i32) -> (i32, i32) {
    %c0_i32 = arith.constant 0 : i32
    %c0_i32_0 = arith.constant 0 : i32
    return %arg0, %c0_i32 : i32, i32
  }
  func.func @transform_3(%arg0: i32) -> (i32, i32) {
    %c0_i32 = arith.constant 0 : i32
    %c0_i32_0 = arith.constant 0 : i32
    %c0_i32_1 = arith.constant 0 : i32
    return %c0_i32, %c0_i32_0 : i32, i32
  }
  func.func @transform_4(%arg0: i32) -> (i32, i32) {
    %c0_i32 = arith.constant 0 : i32
    %c0_i32_0 = arith.constant 0 : i32
    %c0_i32_1 = arith.constant 0 : i32
    return %c0_i32, %c0_i32_0 : i32, i32
  }
  func.func @transform_5(%arg0: i32) -> (i32, i32) {
    %c0_i32 = arith.constant 0 : i32
    %c0_i32_0 = arith.constant 0 : i32
    %c0_i32_1 = arith.constant 0 : i32
    return %c0_i32, %c0_i32_0 : i32, i32
  }
  func.func @transform_6(%arg0: i32) -> (i32, i32) {
    %c0_i32 = arith.constant 0 : i32
    %c0_i32_0 = arith.constant 0 : i32
    %c0_i32_1 = arith.constant 0 : i32
    return %c0_i32, %c0_i32_0 : i32, i32
  }
  func.func @transform_7(%arg0: i32) -> (i32, i32) {
    %c0_i32 = arith.constant 0 : i32
    %c0_i32_0 = arith.constant 0 : i32
    %c0_i32_1 = arith.constant 0 : i32
    return %c0_i32, %c0_i32_0 : i32, i32
  }
  func.func @transform_8(%arg0: i32) -> (i32, i32) {
    %c0_i32 = arith.constant 0 : i32
    %c0_i32_0 = arith.constant 0 : i32
    %c0_i32_1 = arith.constant 0 : i32
    return %c0_i32, %c0_i32_0 : i32, i32
  }
  func.func @transform_9(%arg0: i32) -> (i32, i32) {
    %c0_i32 = arith.constant 0 : i32
    %c0_i32_0 = arith.constant 0 : i32
    %c0_i32_1 = arith.constant 0 : i32
    return %c0_i32, %c0_i32_0 : i32, i32
  }
  func.func @transform_10(%arg0: i32) -> (i32, i32) {
    %c0_i32 = arith.constant 0 : i32
    %c0_i32_0 = arith.constant 0 : i32
    %c0_i32_1 = arith.constant 0 : i32
    return %c0_i32, %c0_i32_0 : i32, i32
  }
  func.func @transform_11(%arg0: i32) -> (i32, i32) {
    %c0_i32 = arith.constant 0 : i32
    %c0_i32_0 = arith.constant 0 : i32
    %c0_i32_1 = arith.constant 0 : i32
    return %c0_i32, %c0_i32_0 : i32, i32
  }
  func.func @transform_12(%arg0: i32) -> (i32, i32, i32) {
    %c0_i32 = arith.constant 0 : i32
    %c0_i32_0 = arith.constant 0 : i32
    %c0_i32_1 = arith.constant 0 : i32
    %c0_i32_2 = arith.constant 0 : i32
    return %c0_i32, %c0_i32_0, %c0_i32_1 : i32, i32, i32
  }
  func.func @transform_13(%arg0: i32) -> (i32, i32, i32) {
    %c0_i32 = arith.constant 0 : i32
    %c0_i32_0 = arith.constant 0 : i32
    %c0_i32_1 = arith.constant 0 : i32
    %c0_i32_2 = arith.constant 0 : i32
    return %c0_i32, %c0_i32_0, %c0_i32_1 : i32, i32, i32
  }
  func.func @transform_14(%arg0: i32) -> (i32, i32) {
    %c0_i32 = arith.constant 0 : i32
    %c0_i32_0 = arith.constant 0 : i32
    %c0_i32_1 = arith.constant 0 : i32
    return %c0_i32, %c0_i32_0 : i32, i32
  }
  func.func @transform_15(%arg0: i32) -> (i32, i32) {
    %c0_i32 = arith.constant 0 : i32
    %c0_i32_0 = arith.constant 0 : i32
    %c0_i32_1 = arith.constant 0 : i32
    return %c0_i32, %c0_i32_0 : i32, i32
  }
  func.func @transform_16(%arg0: i32) -> (i32, i32) {
    %c0_i32 = arith.constant 0 : i32
    %c0_i32_0 = arith.constant 0 : i32
    %c0_i32_1 = arith.constant 0 : i32
    return %c0_i32, %c0_i32_0 : i32, i32
  }
  func.func @transform_17(%arg0: i32) -> (i32, i32) {
    %c0_i32 = arith.constant 0 : i32
    %c0_i32_0 = arith.constant 0 : i32
    return %arg0, %c0_i32 : i32, i32
  }
}

</mosaic_0001>

<bundles_post_ra>
// kernel: tpu_custom_call.1
= control target key start
LH: loop header
LB: loop body
LE: loop exit
PB: predicated region body
PF: predicated region fallthrough
CT: control target
= control target key end

     0   :  { %s1817_s0 = inlined_call_operand.vmem [shape: f32[8,8], index: 0, kind: input, shape index: {}]   ;;  %s1818_s1 = inlined_call_operand.vmem [shape: f32[8,8], index: 1, kind: input, shape index: {}]   ;;  %s1819_s2 = inlined_call_operand.vmem [shape: f32[8,20], index: 2, kind: input, shape index: {}]   ;;  %s1820_s3 = inlined_call_operand.hbm [shape: bf16[36,256], index: 3, kind: input, shape index: {}]   ;;  %s1821_s4 = inlined_call_operand.hbm [shape: f32[1,256], index: 4, kind: input, shape index: {}]   ;;  %s1822_s5 = inlined_call_operand.hbm [shape: bf16[256,128], index: 5, kind: input, shape index: {}]   ;;  %s1823_s6 = inlined_call_operand.vmem [shape: f32[1,128], index: 6, kind: input, shape index: {}]   ;;  %s1824_s7 = inlined_call_operand.vmem [shape: bf16[96,64], index: 7, kind: input, shape index: {}]   ;;  %s1825_s8 = inlined_call_operand.hbm [shape: f32[1,64], index: 8, kind: input, shape index: {}]   ;;  %s1826_s9 = inlined_call_operand.vmem [shape: bf16[44,96], index: 9, kind: input, shape index: {}]   ;;  %s1827_s10 = inlined_call_operand.vmem [shape: f32[2,96], index: 10, kind: input, shape index: {}]   ;;  %s1828_s11 = inlined_call_operand.hbm [shape: f32[1,96], index: 11, kind: input, shape index: {}]   ;;  %s1829_s12 = inlined_call_operand.vmem [shape: bf16[4,32,32], index: 12, kind: input, shape index: {}]   ;;  %s1830_s13 = inlined_call_operand.vmem [shape: f32[6,1,32], index: 13, kind: input, shape index: {}]   ;;  %s1831_s14 = inlined_call_operand.vmem [shape: bf16[40,32], index: 14, kind: input, shape index: {}]   ;;  %s1832_s15 = inlined_call_operand.vmem [shape: bf16[64,32], index: 15, kind: input, shape index: {}]   ;;  %s1833_s16 = inlined_call_operand.vmem [shape: bf16[8,32], index: 16, kind: input, shape index: {}]   ;;  %s1834_s17 = inlined_call_operand.hbm [shape: f32[8,128], index: 17, kind: output, shape index: {}]  }
   0x1   :  { %1835 = sst [smem:[#allocation16_spill]] %s1817_s0 }
   0x2   :  { %1836 = sst [smem:[#allocation17_spill]] %s1818_s1 }
   0x3   :  { %22 = vsyncpa [#allocation3], 0 }
   0x4   :  { %23 = vsyncpa [#allocation6], 0 }
   0x5   :  { %24 = vsyncpa [#allocation9], 0  ;;  %s50_s26 = sshll.u32 %s1821_s4, 4  ;;  %s51_s26 = int_to_ptr.hbm [resolvable:$true] %s50_s26 }
   0x6   :  { %25 = vsyncpa [#allocation4], 0  ;;  %s1480_s27 = smov [#allocation5]   ;;  %s78_s30 = sshll.u32 %s1825_s8, 4  ;;  %s79_s30 = int_to_ptr.hbm [resolvable:$true] %s78_s30 }
   0x7   :  { %s52_s28 = sshll.u32 %s1480_s27, 4  ;;  %s1481_s18 = smov [#allocation8]   ;;  %s53_s28 = int_to_ptr.vmem [resolvable:$true] %s52_s28 }
   0x8   :  { %55 = dma.hbm_to_vmem [thread:$0]  %s51_s26, 32, %s53_s28, [#allocation6]  }
   0x9   :  { %s80_s19 = sshll.u32 %s1481_s18, 4  ;;  %s36_s21 = sshll.u32 %s1820_s3, 4  ;;  %s81_s19 = int_to_ptr.vmem [resolvable:$true] %s80_s19  ;;  %s37_s21 = int_to_ptr.hbm [resolvable:$true] %s36_s21 }
   0xa   :  { %83 = dma.hbm_to_vmem [thread:$0]  %s79_s30, 16, %s81_s19, [#allocation9]  }
   0xb   :  { %s1482_s4 = smov [#allocation2]   ;;  %s60_s25 = sshll.u32 %s1822_s5, 4  ;;  %s61_s25 = int_to_ptr.hbm [resolvable:$true] %s60_s25 }
   0xc   :  { %s38_s22 = sshll.u32 %s1482_s4, 4  ;;  %s1483_s27 = smov 128   ;;  %s39_s22 = int_to_ptr.vmem [resolvable:$true] %s38_s22 }
   0xd   :  { %s1484_s8 = smov 8   ;;  %s1485_s26 = smov [#allocation7]  }
   0xe   :  { %44 = dma.hbm_to_vmem [thread:$0]  %s37_s21, 640, %s39_s22, [#allocation3], %s1483_s27, %s1483_s27, %s1484_s8  }
   0xf   :  { %s62_s28 = sshll.u32 %s1485_s26, 4  ;;  %s1486_s29 = smov 64   ;;  %s63_s28 = int_to_ptr.vmem [resolvable:$true] %s62_s28 }
  0x10   :  { %s1487_s3 = smov 4   ;;  %s93_s18 = sshll.u32 %s1828_s11, 4  ;;  %s94_s18 = int_to_ptr.hbm [resolvable:$true] %s93_s18 }
  0x11   :  { %68 = dma.hbm_to_vmem [thread:$0]  %s61_s25, 2048, %s63_s28, [#allocation6], %s1486_s29, %s1486_s29, %s1487_s3  }
  0x12   :  { %s1488_s19 = smov [#allocation10]  }
  0x13   :  { %s95_s5 = sshll.u32 %s1488_s19, 4  ;;  %s96_s5 = int_to_ptr.vmem [resolvable:$true] %s95_s5 }
  0x14   :  { %98 = dma.hbm_to_vmem [thread:$0]  %s94_s18, 16, %s96_s5, [#allocation9]  }
  0x15   :  { %1472 = dma.done.wait [#allocation3], 640  }
  0x16   :  { %1473 = vsyncadd [#allocation3], 4294966656 }
  0x17   :  { %1474 = dma.done.wait [#allocation6], 2080  }
  0x18   :  { %1475 = vsyncadd [#allocation6], 4294965216 }
  0x19   :  { %1476 = dma.done.wait [#allocation9], 32  }
  0x1a   :  { %1477 = vsyncadd [#allocation9], 4294967264  ;;  %s1837_s21 = sld [smem:[#allocation17_spill]]  ;;  %v132_v1 = vld [vmem:[%s1819_s2] sm:$0xff]  ;;  %s1489_s11 = smov 16   ;;  %vm186_vm0 = vcmask 1041408  }
  0x1b   :  { %v149_v2 = vld [vmem:[#allocation2 + $0x20] sm:$0x33]  ;;  %v1040_v9 = vld [vmem:[#allocation2 + $0x10] sm:$0xf]  ;;  %v1233_v10 = vld [vmem:[#allocation2 + $0x14] sm:$0xf0] }
  0x1c   :  { %v170_v3 = vunpack.c.l.b16 %v149_v2  ;;  %v171_v4 = vunpack.c.h.b16 %v149_v2  ;;  %v1232_v11 = vld [vmem:[#allocation2 + $0x14] sm:$0xf]  ;;  %v1041_v12 = vor.u32 %v1233_v10, %v1040_v9  ;;  %v1042_v13 = vld [vmem:[#allocation2 + $0x18] sm:$0xf0]  ;;  %v1032_v15 = vld [vmem:[#allocation2] sm:$0xf] }
  0x1d   :  { %v1045_v14 = vor.u32 %v1232_v11, %v1042_v13  ;;  %v1231_v16 = vld [vmem:[#allocation2 + $0x4] sm:$0xf0]  ;;  %v1230_v17 = vld [vmem:[#allocation2 + $0x4] sm:$0xf]  ;;  %v1034_v19 = vld [vmem:[#allocation2 + $0x8] sm:$0xf0] }
  0x1e   :  { %v176_v5 = vpack.c.b16 %v170_v3, %v170_v3  ;;  %v177_v6 = vpack.c.b16 %v171_v4, %v171_v4  ;;  %v1033_v18 = vor.u32 %v1231_v16, %v1032_v15  ;;  %v1037_v20 = vor.u32 %v1230_v17, %v1034_v19  ;;  %v1241_v21 = vld [vmem:[#allocation7 + $0x38] sm:$0xff]  ;;  %v1240_v23 = vld [vmem:[#allocation7 + $0x30] sm:$0xff]  ;;  %v1239_v25 = vld [vmem:[#allocation7 + $0x28] sm:$0xff]  ;;  %s1838_s24 = sld [smem:[#allocation16_spill]]  ;;  %s1490_s23 = smov 26  }
  0x1f   :  { %v1249_v22 = vld [vmem:[#allocation7 + $0x78] sm:$0xff]  ;;  %355 = vmatpush.bf16.msra.mxu2 %v1241_v21  ;;  %v1248_v24 = vld [vmem:[#allocation7 + $0x70] sm:$0xff]  ;;  %v1247_v26 = vld [vmem:[#allocation7 + $0x68] sm:$0xff]  ;;  %vm141_vm1 = vcmask 64512   ;;  %vm143_vm2 = vcmask 130048   ;;  %vm182_vm3 = vcmask 293888  }
  0x20   :  { %v131_v0 = vld [vmem:[%s1837_s21] sm:$0xff]  ;;  %v188_v7 = vsel %vm186_vm0, %v176_v5, 0  ;;  %v191_v8 = vsel %vm186_vm0, %v177_v6, 0  ;;  %368 = vmatpush.bf16.msra.mxu3 %v1249_v22  ;;  %v1238_v27 = vld [vmem:[#allocation7 + $0x20] sm:$0xff]  ;;  %v1235_v39 = vld [vmem:[#allocation7 + $0x8] sm:$0xff]  ;;  %vm431_vm4 = vcmask 999216  }
  0x21   :  { %134 = vrot.lane.b32.xlu0 %v131_v0, %s1484_s8  ;;  %198 = vmatpush.bf16.msra.mxu0 %v188_v7  ;;  %v1246_v28 = vld [vmem:[#allocation7 + $0x60] sm:$0xff]  ;;  %v1237_v29 = vld [vmem:[#allocation7 + $0x18] sm:$0xff]  ;;  %v1236_v31 = vld [vmem:[#allocation7 + $0x10] sm:$0xff]  ;;  %vm514_vm5 = vcmask 785408   ;;  %vm582_vm6 = vcmask 261120   ;;  %s1491_s27 = smov 32  }
  0x22   :  { %211 = vmatpush.bf16.msra.mxu1 %v191_v8  ;;  %v1245_v30 = vld [vmem:[#allocation7 + $0x58] sm:$0xff]  ;;  %v1244_v32 = vld [vmem:[#allocation7 + $0x50] sm:$0xff]  ;;  %v1243_v40 = vld [vmem:[#allocation7 + $0x48] sm:$0xff]  ;;  %vm653_vm11 = vcmask 1043456   ;;  %vm532_vm12 = vcmask 326912   ;;  %vm649_vm13 = vcmask 326656  }
  0x23   :  { %356 = vmatpush.bf16.msra.mxu2 %v1240_v23  ;;  %v1234_v41 = vld [vmem:[#allocation7] sm:$0xff]  ;;  %v1254_v44 = vld [vmem:[%s1824_s7 + $0x20] sm:$0xff]  ;;  %v1253_v45 = vld [vmem:[%s1824_s7 + $0x18] sm:$0xff]  ;;  %s1492_s19 = smov 96   ;;  %vm442_vm14 = vcmask 162816   ;;  %s1498_s3 = smov 30  }
  0x24   :  { %369 = vmatpush.bf16.msra.mxu3 %v1248_v24  ;;  %v1622_v34 = vld [vmem:[%s1838_s24] sm:$0xff]  ;;  %v1242_v42 = vld [vmem:[#allocation7 + $0x40] sm:$0xff]  ;;  %v151_v47 = vld [vmem:[#allocation5] sm:$0x3]  ;;  %s1018_s5 = sshll.u32 %s1834_s17, 4  ;;  %s1019_s5 = int_to_ptr.hbm [resolvable:$true] %s1018_s5 }
  0x25   :  { %199 = vmatpush.bf16.msra.mxu0 %v1041_v12  ;;  %v1255_v43 = vld [vmem:[%s1824_s7 + $0x28] sm:$0xff]  ;;  %v1252_v46 = vld [vmem:[%s1824_s7 + $0x10] sm:$0xff]  ;;  %v153_v48 = vperm.slane %v151_v47, 0  ;;  %v154_v49 = vperm.slane %v151_v47, 1  ;;  %v1250_v61 = vld [vmem:[%s1824_s7] sm:$0xff] }
  0x26   :  { %212 = vmatpush.bf16.msra.mxu1 %v1045_v14  ;;  %v1251_v60 = vld [vmem:[%s1824_s7 + $0x8] sm:$0xff]  ;;  %v1299_v62 = vld [vmem:[%s1823_s6] ss:$0 sm:$0xff]  ;;  %s1493_s6 = smov 50  }
  0x27   :  { %357 = vmatpush.bf16.msra.mxu2 %v1239_v25  ;;  %v1257_v8 = vld [vmem:[%s1829_s12 + $0x8] sm:$0xff]  ;;  %v1256_v9 = vld [vmem:[%s1829_s12] sm:$0xff] }
  0x28   :  { %370 = vmatpush.bf16.msra.mxu3 %v1247_v26  ;;  %v1300_v13 = vld [vmem:[#allocation8] ss:$0 sm:$0xff] }
  0x29   :  { %138 = vrot.lane.b32.xlu0 %v132_v1, %s1489_s11  ;;  %200 = vmatpush.bf16.msra.mxu0 %v1033_v18 }
  0x2a   :  { %213 = vmatpush.bf16.msra.mxu1 %v1037_v20  ;;  %v1301_v20 = vld [vmem:[%s1830_s13] ss:$0 sm:$0xff] }
  0x2b   :  { %358 = vmatpush.bf16.msra.mxu2 %v1238_v27 }
  0x2c   :  { %371 = vmatpush.bf16.msra.mxu3 %v1246_v28 }
  0x2d   :  { %520 = vmatpush.bf16.msrb.mxu0 %v1255_v43  ;;  %v1259_v43 = vld [vmem:[%s1831_s14 + $0x8] sm:$0xff] }
  0x2e   :  { %592 = vmatpush.bf16.msrb.mxu1 %v1257_v8 }
  0x2f   :  { %359 = vmatpush.bf16.msra.mxu2 %v1237_v29 }
  0x30   :  { %372 = vmatpush.bf16.msra.mxu3 %v1245_v30 }
  0x31   :  { %521 = vmatpush.bf16.msrb.mxu0 %v1254_v44 }
  0x32   :  { %593 = vmatpush.bf16.msrb.mxu1 %v1256_v9 }
  0x33   :  { %360 = vmatpush.bf16.msra.mxu2 %v1236_v31 }
  0x34   :  { %373 = vmatpush.bf16.msra.mxu3 %v1244_v32 }
  0x35   :  { %522 = vmatpush.bf16.msrb.mxu0 %v1253_v45  ;;  %v1258_v45 = vld [vmem:[%s1831_s14] sm:$0xff] }
  0x37   :  { %361 = vmatpush.bf16.msra.mxu2 %v1235_v39  ;;  %v627_v39 = vld [vmem:[%s1831_s14 + $0x10] sm:$0xf]  ;;  %s1500_s14 = smov 24  }
  0x38   :  { %374 = vmatpush.bf16.msra.mxu3 %v1243_v40  ;;  %v643_v40 = vunpack.c.l.b16 %v627_v39 }
  0x39   :  { %523 = vmatpush.bf16.msrb.mxu0 %v1252_v46 }
  0x3b   :  { %362 = vmatpush.bf16.msra.mxu2 %v1234_v41  ;;  %v646_v41 = vpack.c.b16 %v643_v40, %v643_v40 }
  0x3c   :  { %375 = vmatpush.bf16.msra.mxu3 %v1242_v42 }
  0x3d   :  { %524 = vmatpush.bf16.msrb.mxu0 %v1251_v60  ;;  %v655_v42 = vsel %vm653_vm11, %v646_v41, 0 }
  0x41   :  { %525 = vmatpush.bf16.msrb.mxu0 %v1250_v61 }
  0x93   :  { %v135_v33 = vpop.permute.xlu0 %134 }
  0x94   :  { %v142_v35 = vsel %vm141_vm1, %v1622_v34, %v135_v33 }
  0x9b   :  { %v139_v36 = vpop.permute.xlu0 %138 }
  0x9c   :  { %v144_v37 = vsel %vm143_vm2, %v142_v35, %v139_v36 }
  0x9d   :  { %v150_v38 = vpack.c.bf16 %v144_v37, %v144_v37 }
  0x9f   :  { %1046 = vmatmul.msk.bf16.vlgmr.msra.gmra.mxu0 %vm182_vm3, %v150_v38  ;;  %1047 = vmatmul.msk.bf16.vlgmr.msra.gmra.mxu1 %vm182_vm3, %v150_v38 }
  0xa0   :  { %662 = vmatpush.bf16.msra.mxu1 %v655_v42 }
  0xa4   :  { %663 = vmatpush.bf16.msra.mxu1 %v1259_v43 }
  0xa8   :  { %664 = vmatpush.bf16.msra.mxu1 %v1258_v45 }
 0x11c   :  { %v202_v50 = vpop.f32.mrf.mxu0  ;;  %v215_v51 = vpop.f32.mrf.mxu1 }
 0x11d   :  { %v203_v52 = vadd.f32 %v202_v50, %v153_v48  ;;  %v216_v53 = vadd.f32 %v215_v51, %v154_v49 }
 0x11f   :  { %v219_v54 = vmax.f32 %v203_v52, 0.0  ;;  %v220_v55 = vmax.f32 %v216_v53, 0.0 }
 0x121   :  { %v253_v56 = vpack.c.bf16 %v219_v54, %v219_v54  ;;  %v254_v57 = vpack.c.bf16 %v220_v55, %v220_v55  ;;  %v1261_v55 = vld [vmem:[%s1829_s12 + $0x18] sm:$0xff] }
 0x122   :  { %703 = vmatpush.bf16.msrb.mxu2 %v1261_v55  ;;  %v1262_v55 = vld [vmem:[%s1826_s9] sm:$0xff] }
 0x123   :  { %363 = vmatmul.bf16.vlgmr.msra.gmra.mxu2 %v253_v56  ;;  %376 = vmatmul.bf16.vlgmr.msra.gmra.mxu3 %v254_v57  ;;  %v1260_v56 = vld [vmem:[%s1829_s12 + $0x10] sm:$0xff]  ;;  %v1302_v57 = vld [vmem:[%s1830_s13 + $0x4] ss:$0 sm:$0xff] }
 0x124   :  { %v204_v58 = vpop.f32.mrf.mxu0  ;;  %v217_v59 = vpop.f32.mrf.mxu1 }
 0x126   :  { %704 = vmatpush.bf16.msrb.mxu2 %v1260_v56  ;;  %v1268_v56 = vld [vmem:[%s1832_s15 + $0x18] sm:$0xff] }
 0x127   :  { %838 = vmatpush.bf16.msra.mxu0 %v1268_v56 }
 0x1a6   :  { %v364_v63 = vpop.f32.mrf.mxu2  ;;  %v377_v0 = vpop.f32.mrf.mxu3 }
 0x1a7   :  { %v365_v1 = vadd.f32 %v1299_v62, %v364_v63 }
 0x1a9   :  { %v1648_v2 = vadd.f32 %v377_v0, %v365_v1 }
 0x1ab   :  { %v432_v3 = vsel %vm431_vm4, %v1648_v2, -inf  ;;  %v1652_v4 = vmax.f32 %v1648_v2, 0.0 }
 0x1ac   :  { %433 = vmax.xlane.f32.xlu2 %v432_v3 }
 0x1ad   :  { %v473_v5 = vpack.c.bf16 %v1652_v4, %v1652_v4 }
 0x1ae   :  { %v366_v6 = vpop.f32.mrf.mxu2  ;;  %v379_v7 = vpop.f32.mrf.mxu3 }
 0x1af   :  { %1136 = vmatmul.msk.bf16.vlgmr.msrb.gmra.mxu0 %vm514_vm5, %v473_v5 }
 0x21f   :  { %v434_v10 = vpop.xlane.xlu2 %433 }
 0x220   :  { %v435_v11 = vsub.f32 %v1648_v2, %v434_v10 }
 0x222   :  { %v436_v12 = vmul.f32 1.442695, %v435_v11 }
 0x224   :  { %1308 = vpow2.f32 %v436_v12 }
 0x22a   :  { %v1663_v14 = vpop.eup %1308 }
 0x22b   :  { %439 = vrot.lane.b32.xlu0 %v1663_v14, %s1490_s23 }
 0x22c   :  { %v527_v15 = vpop.f32.mrf.mxu0 }
 0x22d   :  { %v1666_v16 = vadd.f32 %v1300_v13, %v527_v15 }
 0x22f   :  { %v531_v17 = vmax.f32 %v1666_v16, 0.0  ;;  %v533_v44 = vsel %vm532_vm12, %v1666_v16, -inf }
 0x231   :  { %v565_v18 = vpack.c.bf16 %v531_v17, %v531_v17  ;;  %v382_v17 = vsub.f32 0.0, %v1648_v2 }
 0x233   :  { %1145 = vmatmul.msk.bf16.vlgmr.msrb.gmra.mxu1 %vm582_vm6, %v565_v18  ;;  %v383_v18 = vmul.f32 1.442695, %v382_v17 }
 0x234   :  { %v529_v19 = vpop.f32.mrf.mxu0 }
 0x235   :  { %v1494_v19 = vmov 96  }
 0x236   :  { %1296 = vset.pattern.permute.xlu1 %v1494_v19 }
 0x29d   :  { %v440_v53 = vpop.permute.xlu0 %439 }
 0x29e   :  { %v443_v54 = vsel %vm442_vm14, %v440_v53, 0.0 }
 0x2b0   :  { %v595_v21 = vpop.f32.mrf.mxu1 }
 0x2b1   :  { %v596_v22 = vadd.f32 %v1301_v20, %v595_v21 }
 0x2b3   :  { %v599_v23 = vsub.f32 0.0, %v596_v22  ;;  %v1495_v22 = vmov 97  }
 0x2b4   :  { %1298 = vset.pattern.permute.xlu0 %v1495_v22 }
 0x2b5   :  { %v600_v24 = vmul.f32 1.442695, %v599_v23 }
 0x2b7   :  { %1310 = vpow2.f32 %v600_v24 }
 0x2b8   :  { %v597_v25 = vpop.f32.mrf.mxu1 }
 0x2bd   :  { %v1311_v26 = vpop.eup %1310 }
 0x2be   :  { %v602_v27 = vadd.f32 1.0, %v1311_v26 }
 0x2c0   :  { %1312 = vrcp.f32 %v602_v27  ;;  %v614_v31 = vand.u32 2147483648, %v602_v27  ;;  %v612_v33 = vand.u32 2147483647, %v602_v27  ;;  %vm608_vm8 = vweird.f32 %v602_v27 }
 0x2c2   :  { %v615_v36 = vor.u32 1.1754944e-38, %v614_v31  ;;  %vm613_vm10 = vcmp.eq.f32.partialorder %v612_v33, 8.507059e+37 }
 0x2c6   :  { %v1313_v28 = vpop.eup %1312 }
 0x2c7   :  { %v604_v29 = vmul.f32 %v1313_v28, %v602_v27  ;;  %vm609_vm7 = vweird.f32 %v1313_v28 }
 0x2c8   :  { %vm610_vm9 = vmor %vm608_vm8, %vm609_vm7 }
 0x2c9   :  { %v605_v30 = vsub.f32 1.0, %v604_v29 }
 0x2cb   :  { %v606_v32 = vmul.f32 %v1313_v28, %v605_v30 }
 0x2cd   :  { %v607_v35 = vadd.f32 %v1313_v28, %v606_v32 }
 0x2cf   :  { %v611_v37 = vsel %vm610_vm9, %v1313_v28, %v607_v35 }
 0x2d0   :  { %v1673_v38 = vsel %vm613_vm10, %v615_v36, %v611_v37 }
 0x2d1   :  { %619 = vrot.lane.b32.xlu1 %v1673_v38, %s1491_s27 }
 0x2fb   :  { %534 = vmax.xlane.f32.xlu1 %v533_v44 }
 0x343   :  { %v620_v46 = vpop.permute.xlu1 %619 }
 0x344   :  { %v622_v47 = vsel %vm582_vm6, %v1652_v4, %v620_v46 }
 0x345   :  { %v628_v48 = vpack.c.bf16 %v622_v47, %v622_v47 }
 0x347   :  { %1155 = vmatmul.msk.bf16.vlgmr.msra.gmra.mxu1 %vm649_vm13, %v628_v48 }
 0x36e   :  { %v535_v49 = vpop.xlane.xlu1 %534 }
 0x36f   :  { %v536_v50 = vsub.f32 %v1666_v16, %v535_v49 }
 0x371   :  { %v537_v51 = vmul.f32 1.442695, %v536_v50  ;;  %v1180_v50 = vld [vmem:[%s1826_s9 + $0x10] sm:$0xf] }
 0x373   :  { %1314 = vpow2.f32 %v537_v51  ;;  %v1264_v51 = vld [vmem:[%s1826_s9 + $0x10] sm:$0x30] }
 0x379   :  { %v1691_v52 = vpop.eup %1314 }
 0x37a   :  { %540 = vrot.lane.b32.xlu2 %v1691_v52, %s1492_s19  ;;  %s1499_s19 = smov 111  }
 0x3a3   :  { %444 = vadd.xlane.f32.xlu2 %v443_v54  ;;  %v1263_v54 = vld [vmem:[%s1826_s9 + $0x8] sm:$0xff] }
 0x3c4   :  { %v666_v58 = vpop.f32.mrf.mxu1 }
 0x3c5   :  { %v667_v59 = vadd.f32 %v1302_v57, %v666_v58  ;;  %v1267_v57 = vld [vmem:[%s1832_s15 + $0x10] sm:$0xff] }
 0x3c6   :  { %839 = vmatpush.bf16.msra.mxu0 %v1267_v57 }
 0x3c7   :  { %v670_v60 = vmax.f32 %v667_v59, 0.0 }
 0x3c9   :  { %v676_v61 = vpack.c.bf16 %v670_v60, %v670_v60 }
 0x3cb   :  { %1169 = vmatmul.msk.bf16.vlgmr.msrb.gmra.mxu2 %vm582_vm6, %v676_v61 }
 0x3cc   :  { %v668_v62 = vpop.f32.mrf.mxu1 }
 0x3d4   :  { %v541_v63 = vpop.permute.xlu2 %540 }
 0x3d5   :  { %v543_v0 = vsel %vm141_vm1, %v541_v63, 0.0 }
 0x3d6   :  { %544 = vadd.xlane.f32.xlu0 %v543_v0 }
 0x416   :  { %v445_v1 = vpop.xlane.xlu2 %444 }
 0x417   :  { %1316 = vrcp.f32 %v445_v1  ;;  %v457_v7 = vand.u32 2147483648, %v445_v1  ;;  %v455_v9 = vand.u32 2147483647, %v445_v1  ;;  %vm451_vm0 = vweird.f32 %v445_v1 }
 0x418   :  { %1318 = vpow2.f32 %v383_v18  ;;  %v1304_v18 = vld [vmem:[#allocation10] ss:$0 sm:$0xff] }
 0x419   :  { %v458_v11 = vor.u32 1.1754944e-38, %v457_v7  ;;  %vm456_vm4 = vcmp.eq.f32.partialorder %v455_v9, 8.507059e+37  ;;  %v726_v7 = vld [vmem:[%s1827_s10] sm:$0x3] }
 0x41a   :  { %v783_v9 = vperm.slane %v726_v7, 1 }
 0x41d   :  { %v1317_v3 = vpop.eup %1316 }
 0x41e   :  { %v447_v5 = vmul.f32 %v1317_v3, %v445_v1  ;;  %vm452_vm15 = vweird.f32 %v1317_v3  ;;  %v1319_v20 = vpop.eup %1318  ;;  %v1266_v1 = vld [vmem:[%s1832_s15 + $0x8] sm:$0xff] }
 0x41f   :  { %vm453_vm3 = vmor %vm451_vm0, %vm452_vm15  ;;  %v385_v21 = vadd.f32 1.0, %v1319_v20  ;;  %vm762_vm15 = vcmask 1045504   ;;  %vm724_vm0 = vcmask 195584   ;;  %840 = vmatpush.bf16.msra.mxu0 %v1266_v1 }
 0x420   :  { %v448_v6 = vsub.f32 1.0, %v447_v5  ;;  %v1269_v5 = vld [vmem:[%s1829_s12 + $0x20] sm:$0xff] }
 0x421   :  { %1320 = vrcp.f32 %v385_v21  ;;  %v397_v45 = vand.u32 2147483648, %v385_v21  ;;  %vm391_vm12 = vweird.f32 %v385_v21  ;;  %v395_v46 = vand.u32 2147483647, %v385_v21 }
 0x422   :  { %v449_v8 = vmul.f32 %v1317_v3, %v448_v6 }
 0x423   :  { %v398_v48 = vor.u32 1.1754944e-38, %v397_v45  ;;  %vm396_vm14 = vcmp.eq.f32.partialorder %v395_v46, 8.507059e+37 }
 0x424   :  { %v450_v10 = vadd.f32 %v1317_v3, %v449_v8  ;;  %v739_v8 = vperm.slane %v726_v7, 0 }
 0x426   :  { %v454_v12 = vsel %vm453_vm3, %v1317_v3, %v450_v10  ;;  %vm758_vm3 = vcmask 359424   ;;  %v1265_v3 = vld [vmem:[%s1832_s15] sm:$0xff] }
 0x427   :  { %v459_v13 = vsel %vm456_vm4, %v458_v11, %v454_v12  ;;  %v1321_v24 = vpop.eup %1320  ;;  %841 = vmatpush.bf16.msra.mxu0 %v1265_v3  ;;  %vm412_vm4 = vcmask 23552  }
 0x428   :  { %v1706_v15 = vmul.f32 %v1663_v14, %v459_v13  ;;  %v1303_v14 = vld [vmem:[%s1830_s13 + $0x1] ss:$0 sm:$0xff]  ;;  %v387_v29 = vmul.f32 %v1321_v24, %v385_v21  ;;  %vm392_vm10 = vweird.f32 %v1321_v24 }
 0x429   :  { %vm393_vm13 = vmor %vm391_vm12, %vm392_vm10  ;;  %vm991_vm10 = vcmask 121856   ;;  %vm993_vm12 = vcmask 187392  }
 0x42a   :  { %719 = vrot.lane.b32.xlu2 %v1706_v15, %s1493_s6  ;;  %v388_v35 = vsub.f32 1.0, %v387_v29 }
 0x42c   :  { %v389_v41 = vmul.f32 %v1321_v24, %v388_v35 }
 0x42e   :  { %v390_v44 = vadd.f32 %v1321_v24, %v389_v41 }
 0x430   :  { %v394_v47 = vsel %vm393_vm13, %v1321_v24, %v390_v44  ;;  %vm998_vm13 = vcmask 588800  }
 0x431   :  { %v1723_v49 = vsel %vm396_vm14, %v398_v48, %v394_v47  ;;  %vm1000_vm14 = vcmask 596992  }
 0x449   :  { %v545_v23 = vpop.xlane.xlu0 %544 }
 0x44a   :  { %1322 = vrcp.f32 %v545_v23  ;;  %v557_v31 = vand.u32 2147483648, %v545_v23  ;;  %v555_v33 = vand.u32 2147483647, %v545_v23  ;;  %vm551_vm7 = vweird.f32 %v545_v23 }
 0x44c   :  { %v558_v39 = vor.u32 1.1754944e-38, %v557_v31  ;;  %vm556_vm9 = vcmp.eq.f32.partialorder %v555_v33, 8.507059e+37 }
 0x44e   :  { %v706_v25 = vpop.f32.mrf.mxu2 }
 0x44f   :  { %v1714_v26 = vadd.f32 %v1303_v14, %v706_v25  ;;  %v887_v14 = vld [vmem:[%s1833_s16] sm:$0xf]  ;;  %v1305_v25 = vld [vmem:[%s1830_s13 + $0x5] ss:$0 sm:$0xff]  ;;  %s1497_s16 = smov 57  }
 0x450   :  { %v1323_v27 = vpop.eup %1322  ;;  %v893_v24 = vsel %vm653_vm11, %v887_v14, 0  ;;  %vm401_vm11 = vcmask 827152  }
 0x451   :  { %v547_v28 = vmul.f32 %v1323_v27, %v545_v23  ;;  %715 = vrot.lane.b32.xlu0 %v1714_v26, %s1489_s11  ;;  %vm552_vm5 = vweird.f32 %v1323_v27  ;;  %s1496_s11 = smov 104   ;;  %902 = vmatpush.bf16.msra.mxu2 %v893_v24  ;;  %v402_v41 = vsel %vm401_vm11, %v1648_v2, -inf  ;;  %vm1006_vm11 = vcmask 793600  }
 0x452   :  { %vm553_vm8 = vmor %vm551_vm7, %vm552_vm5 }
 0x453   :  { %v548_v30 = vsub.f32 1.0, %v547_v28 }
 0x455   :  { %v549_v32 = vmul.f32 %v1323_v27, %v548_v30 }
 0x456   :  { %v708_v36 = vpop.f32.mrf.mxu2 }
 0x457   :  { %v550_v37 = vadd.f32 %v1323_v27, %v549_v32  ;;  %v1306_v32 = vld [vmem:[%s1830_s13 + $0x2] ss:$0 sm:$0xff] }
 0x459   :  { %v554_v40 = vsel %vm553_vm8, %v1323_v27, %v550_v37 }
 0x45a   :  { %v559_v42 = vsel %vm556_vm9, %v558_v39, %v554_v40 }
 0x45b   :  { %v1719_v43 = vmul.f32 %v1691_v52, %v559_v42  ;;  %v1181_v52 = vor.u32 %v1264_v51, %v1180_v50 }
 0x45d   :  { %711 = vrot.lane.b32.xlu1 %v1719_v43, %s1496_s11  ;;  %v764_v53 = vsel %vm762_vm15, %v1181_v52, 0  ;;  %vm1002_vm15 = vcmask 605184  }
 0x45e   :  { %771 = vmatpush.bf16.msrb.mxu3 %v764_v53 }
 0x462   :  { %772 = vmatpush.bf16.msrb.mxu3 %v1263_v54 }
 0x465   :  { %736 = vperm.xlu1 %1296, %v1723_v49  }
 0x466   :  { %773 = vmatpush.bf16.msrb.mxu3 %v1262_v55 }
 0x46d   :  { %1297 = vset.pattern.permute.xlu1 %v1495_v22 }
 0x46e   :  { %780 = vperm.xlu1 %1297, %v1723_v49  }
 0x484   :  { %v720_v61 = vpop.permute.xlu2 %719 }
 0x4c3   :  { %v716_v59 = vpop.permute.xlu0 %715 }
 0x4cf   :  { %v712_v58 = vpop.permute.xlu1 %711 }
 0x4d0   :  { %v722_v60 = vsel %vm141_vm1, %v1622_v34, %v712_v58  ;;  %v1270_v34 = vld [vmem:[%s1829_s12 + $0x28] sm:$0xff] }
 0x4d1   :  { %v723_v62 = vsel %vm143_vm2, %v722_v60, %v716_v59  ;;  %880 = vmatpush.bf16.msrb.mxu1 %v1270_v34  ;;  %vm830_vm2 = vcmask 523264  }
 0x4d2   :  { %v725_v63 = vsel %vm724_vm0, %v723_v62, %v720_v61 }
 0x4d3   :  { %v733_v0 = vpack.c.bf16 %v725_v63, %v725_v63 }
 0x4d5   :  { %1182 = vmatmul.msk.bf16.vlgmr.msrb.gmra.mxu3 %vm758_vm3, %v733_v0  ;;  %881 = vmatpush.bf16.msrb.mxu1 %v1269_v5  ;;  %vm1004_vm3 = vcmask 629760  }
 0x4d7   :  { %v737_v6 = vpop.permute.xlu1 %736 }
 0x4d8   :  { %v740_v11 = vmul.f32 %v739_v8, %v737_v6 }
 0x4e0   :  { %v781_v10 = vpop.permute.xlu1 %780 }
 0x4e1   :  { %v784_v13 = vmul.f32 %v783_v9, %v781_v10 }
 0x558   :  { %v775_v12 = vpop.f32.mrf.mxu3 }
 0x559   :  { %v776_v17 = vadd.f32 %v775_v12, %v740_v11 }
 0x55b   :  { %v785_v19 = vadd.f32 %v784_v13, %v776_v17 }
 0x55d   :  { %v790_v20 = vadd.f32 %v1304_v18, %v785_v19 }
 0x55f   :  { %v791_v21 = vmax.f32 %v790_v20, 0.0 }
 0x560   :  { %v777_v22 = vpop.f32.mrf.mxu3 }
 0x561   :  { %v800_v23 = vpack.c.bf16 %v791_v21, %v791_v21 }
 0x563   :  { %1200 = vmatmul.msk.bf16.vlgmr.msra.gmra.mxu0 %vm830_vm2, %v800_v23 }
 0x5e0   :  { %v843_v27 = vpop.f32.mrf.mxu0 }
 0x5e1   :  { %v844_v28 = vadd.f32 %v1305_v25, %v843_v27 }
 0x5e3   :  { %v847_v29 = vmax.f32 %v844_v28, 0.0 }
 0x5e5   :  { %v853_v30 = vpack.c.bf16 %v847_v29, %v847_v29 }
 0x5e7   :  { %1214 = vmatmul.msk.bf16.vlgmr.msrb.gmra.mxu1 %vm582_vm6, %v853_v30 }
 0x5e8   :  { %v845_v31 = vpop.f32.mrf.mxu0 }
 0x664   :  { %v883_v33 = vpop.f32.mrf.mxu1 }
 0x665   :  { %v1776_v35 = vadd.f32 %v1306_v32, %v883_v33 }
 0x667   :  { %v888_v36 = vpack.c.bf16 %v1776_v35, %v1776_v35 }
 0x669   :  { %1215 = vmatmul.msk.bf16.vlgmr.msra.gmra.mxu2 %vm141_vm1, %v888_v36 }
 0x66c   :  { %v885_v37 = vpop.f32.mrf.mxu1 }
 0x6ec   :  { %v904_v39 = vpop.f32.mrf.mxu2 }
 0x6ed   :  { %909 = vrot.lane.b32.xlu0 %v904_v39, %s1486_s29 }
 0x6f4   :  { %v906_v40 = vpop.f32.mrf.mxu2 }
 0x717   :  { %403 = vmax.xlane.f32.xlu0 %v402_v41 }
 0x72b   :  { %970 = vrot.lane.b32.xlu0 %v1652_v4, %s1491_s27  ;;  %v1272_v4 = vld [vmem:[%s1829_s12 + $0x38] sm:$0xff] }
 0x72c   :  { %949 = vmatpush.bf16.msra.mxu3 %v1272_v4 }
 0x733   :  { %987 = vrot.lane.b32.xlu0 %v1666_v16, %s1497_s16  ;;  %v1271_v16 = vld [vmem:[%s1829_s12 + $0x30] sm:$0xff] }
 0x734   :  { %950 = vmatpush.bf16.msra.mxu3 %v1271_v16 }
 0x75f   :  { %v910_v42 = vpop.permute.xlu0 %909 }
 0x760   :  { %v912_v44 = vadd.f32 %v910_v42, %v790_v20 }
 0x762   :  { %v913_v45 = vmax.f32 %v912_v44, 0.0 }
 0x764   :  { %v919_v46 = vpack.c.bf16 %v913_v45, %v913_v45 }
 0x766   :  { %926 = vrot.lane.b32.xlu1 %v919_v46, %s1486_s29 }
 0x78a   :  { %v404_v47 = vpop.xlane.xlu0 %403 }
 0x78b   :  { %v405_v48 = vsub.f32 %v1648_v2, %v404_v47 }
 0x78d   :  { %v406_v50 = vmul.f32 1.442695, %v405_v48 }
 0x78f   :  { %1324 = vpow2.f32 %v406_v50 }
 0x795   :  { %v1325_v51 = vpop.eup %1324 }
 0x796   :  { %409 = vrot.lane.b32.xlu2 %v1325_v51, %s1498_s3 }
 0x79d   :  { %v971_v12 = vpop.permute.xlu0 %970 }
 0x79e   :  { %960 = vrot.lane.b32.xlu2 %v1719_v43, %s1499_s19  ;;  %v1307_v43 = vld [vmem:[%s1830_s13 + $0x3] ss:$0 sm:$0xff]  ;;  %s1501_s13 = smov 103  }
 0x7a5   :  { %v988_v23 = vpop.permute.xlu0 %987 }
 0x7a6   :  { %963 = vrot.lane.b32.xlu2 %v1723_v49, %s1493_s6 }
 0x7ae   :  { %966 = vrot.lane.b32.xlu2 %v1714_v26, %s1500_s14 }
 0x7b6   :  { %973 = vrot.lane.b32.xlu2 %v1673_v38, %s1486_s29 }
 0x7d8   :  { %v927_v2 = vpop.permute.xlu1 %926 }
 0x7d9   :  { %1229 = vmatmul.msk.bf16.vlgmr.msra.gmra.mxu3 %vm582_vm6, %v927_v2 }
 0x7f0   :  { %v410_v52 = vpop.permute.xlu2 %409 }
 0x7f1   :  { %v413_v53 = vsel %vm412_vm4, %v410_v52, 0.0 }
 0x7f2   :  { %414 = vadd.xlane.f32.xlu1 %v413_v53 }
 0x7f8   :  { %v961_v3 = vpop.permute.xlu2 %960 }
 0x800   :  { %v964_v34 = vpop.permute.xlu2 %963 }
 0x808   :  { %v967_v5 = vpop.permute.xlu2 %966 }
 0x80b   :  { %976 = vrot.lane.b32.xlu1 %v1723_v49, %s1496_s11 }
 0x810   :  { %v974_v6 = vpop.permute.xlu2 %973 }
 0x85c   :  { %v952_v54 = vpop.f32.mrf.mxu3 }
 0x85d   :  { %v953_v55 = vadd.f32 %v1307_v43, %v952_v54 }
 0x85f   :  { %957 = vrot.lane.b32.xlu2 %v953_v55, %s1484_s8  ;;  %s1502_s8 = smov [#allocation11]  }
 0x860   :  { %s1016_s29 = sshll.u32 %s1502_s8, 4  ;;  %s1017_s29 = int_to_ptr.vmem [resolvable:$true] %s1016_s29 }
 0x864   :  { %v954_v26 = vpop.f32.mrf.mxu3 }
 0x865   :  { %v415_v38 = vpop.xlane.xlu1 %414 }
 0x866   :  { %1326 = vrcp.f32 %v415_v38  ;;  %v427_v59 = vand.u32 2147483648, %v415_v38  ;;  %v425_v61 = vand.u32 2147483647, %v415_v38  ;;  %vm421_vm7 = vweird.f32 %v415_v38 }
 0x868   :  { %v428_v62 = vor.u32 1.1754944e-38, %v427_v59  ;;  %vm426_vm9 = vcmp.eq.f32.partialorder %v425_v61, 8.507059e+37 }
 0x86c   :  { %v1327_v56 = vpop.eup %1326 }
 0x86d   :  { %v417_v57 = vmul.f32 %v1327_v56, %v415_v38  ;;  %vm422_vm5 = vweird.f32 %v1327_v56 }
 0x86e   :  { %vm423_vm8 = vmor %vm421_vm7, %vm422_vm5 }
 0x86f   :  { %v418_v58 = vsub.f32 1.0, %v417_v57 }
 0x871   :  { %v419_v60 = vmul.f32 %v1327_v56, %v418_v58 }
 0x873   :  { %v420_v49 = vadd.f32 %v1327_v56, %v419_v60 }
 0x875   :  { %v424_v63 = vsel %vm423_vm8, %v1327_v56, %v420_v49 }
 0x876   :  { %v429_v0 = vsel %vm426_vm9, %v428_v62, %v424_v63 }
 0x877   :  { %v430_v1 = vmul.f32 %v1325_v51, %v429_v0 }
 0x879   :  { %980 = vrot.lane.b32.xlu2 %v430_v1, %s1496_s11 }
 0x87d   :  { %v977_v18 = vpop.permute.xlu1 %976 }
 0x881   :  { %983 = vrot.lane.b32.xlu2 %v1706_v15, %s1501_s13 }
 0x8b9   :  { %v958_v7 = vpop.permute.xlu2 %957 }
 0x8ba   :  { %v990_v8 = vsel %vm141_vm1, %v1776_v35, %v958_v7  ;;  %vm1008_vm1 = vcmask 957440  }
 0x8bb   :  { %v992_v9 = vsel %vm991_vm10, %v990_v8, %v961_v3 }
 0x8bc   :  { %v994_v10 = vsel %vm993_vm12, %v992_v9, %v964_v34 }
 0x8bd   :  { %v995_v11 = vsel %vm724_vm0, %v994_v10, %v967_v5 }
 0x8be   :  { %v996_v13 = vsel %vm582_vm6, %v995_v11, %v971_v12 }
 0x8bf   :  { %v997_v15 = vsel %vm830_vm2, %v996_v13, %v974_v6 }
 0x8c0   :  { %v999_v19 = vsel %vm998_vm13, %v997_v15, %v977_v18 }
 0x8c1   :  { %v1001_v20 = vsel %vm1000_vm14, %v999_v19, %v977_v18 }
 0x8d3   :  { %v981_v17 = vpop.permute.xlu2 %980 }
 0x8d4   :  { %v1003_v21 = vsel %vm1002_vm15, %v1001_v20, %v981_v17 }
 0x8db   :  { %v984_v22 = vpop.permute.xlu2 %983 }
 0x8dc   :  { %v1005_v14 = vsel %vm1004_vm3, %v1003_v21, %v984_v22 }
 0x8dd   :  { %v1007_v24 = vsel %vm1006_vm11, %v1005_v14, %v988_v23 }
 0x8de   :  { %v1009_v25 = vsel %vm1008_vm1, %v1007_v24, 0.0 }
 0x8df   :  { %1010 = vst [vmem:[#allocation11] sm:$0xff] %v1009_v25 }
 0x8e0   :  { %1021 = dma.vmem_to_hbm [thread:$0]  %s1017_s29, 128, %s1019_s5, [#allocation4]  }
 0x8e1   :  { %1478 = dma.done.wait [#allocation4], 128  }
 0x8e2   :  { %1479 = vsyncadd [#allocation4], 4294967168 }
 0x8e3   :  { %1026 = vsyncpa [#allocation3], 1 }
 0x8e4   :  { %1027 = vsyncpa [#allocation6], 1 }
 0x8e5   :  { %1028 = vsyncpa [#allocation9], 1 }
 0x8e6   :  { %1029 = vsyncpa [#allocation4], 1 }

</bundles_post_ra>
